<compile_context>
chip_gen: v6e
topology: v6e:2x2x1
jax: 0.10.0
libtpu: 0.0.40
codegen_flags: <defaults>
</compile_context>

<pallas_src>
import functools
import math

import jax
import jax.numpy as jnp
from jax import lax
from jax.experimental import pallas as pl
from jax.experimental.pallas import tpu as pltpu

EMB_DIM = 64
NUM_TARGETS = 144          # emb_dim * 2 + 16, with emb_dim = 64
NEG_SLOPE = 0.01           # nn.LeakyReLU default negative slope
VMEM_LIMIT = 32 * 1024 * 1024


def _leaky_relu(x):
    return jnp.where(x > 0, x, NEG_SLOPE * x)


def _vmem_spec():
    return pl.BlockSpec(memory_space=pltpu.MemorySpace.VMEM)


def _round_up(x, m):
    return ((x + m - 1) // m) * m


def _dot_nt(a, b):
    # a @ b.T without materializing a transpose: contract the lane dims on the MXU.
    return lax.dot_general(a, b, (((1,), (1,)), ((), ())),
                           preferred_element_type=jnp.float32)


# -----------------------------------------------------------------------------
# Kernel 1: segment mean/max over the combined atom stream + MaskedAutoencoder1.
# grid = (atom tile,)  ->  "arbitrary" (reduction axis, VMEM accumulators).
# -----------------------------------------------------------------------------
def _hidden_loss_kernel(idx_row_ref, idx_col_ref, x_ref, lat_ref,
                        w1_ref, b1_ref, w2_ref, b2_ref,
                        hl_ref, sum_sc, max_sc, cnt_sc):
    t = pl.program_id(0)
    nb, d = sum_sc.shape                                 # nb = 2 * num_graphs

    @pl.when(t == 0)
    def _():
        sum_sc[...] = jnp.zeros_like(sum_sc)
        cnt_sc[...] = jnp.zeros_like(cnt_sc)
        max_sc[...] = jnp.full_like(max_sc, jnp.finfo(jnp.float32).min)

    xv = x_ref[...]                                      # [tile, d]  bf16
    idxr = idx_row_ref[...]                              # [1, tile]  int32 (pad = -1)
    idxc = idx_col_ref[...]                              # [tile, 1]  int32
    tile = xv.shape[0]

    # segment-sum and counts on the MXU (bf16 inputs, f32 accumulation).
    bids = lax.broadcasted_iota(jnp.int32, (nb, tile), 0)
    onehot = (bids == idxr).astype(jnp.bfloat16)         # [nb, tile], exact in bf16
    sum_sc[...] += jnp.dot(onehot, xv, preferred_element_type=jnp.float32)
    ones_col = jnp.ones((tile, 1), jnp.bfloat16)
    cnt_sc[...] += jnp.dot(onehot, ones_col, preferred_element_type=jnp.float32)

    # segment-max: per-graph running max, no [nb, tile, d] intermediate.
    neg = jnp.asarray(jnp.finfo(jnp.bfloat16).min, jnp.bfloat16)

    @pl.loop(0, nb)
    def _(g):
        masked = jnp.where(idxc == g, xv, neg)           # [tile, d] bf16
        col_max = jnp.max(masked, axis=0, keepdims=True).astype(jnp.float32)
        cur = max_sc[pl.ds(g, 1), :]
        max_sc[pl.ds(g, 1), :] = jnp.maximum(cur, col_max)

    @pl.when(t == pl.num_programs(0) - 1)
    def _():
        cnt = cnt_sc[...]
        mean = sum_sc[...] / jnp.maximum(cnt, 1.0)
        # empty segments -> 0 (torch_scatter behaviour), never the -inf sentinel.
        maxf = jnp.where(cnt > 0.0, max_sc[...], 0.0)
        # MaskedAutoencoder1 on the stacked lattice rows: [2*nb, 3] -> [2*nb, 8]
        h = _leaky_relu(jnp.dot(lat_ref[...], w1_ref[...],
                                preferred_element_type=jnp.float32) + b1_ref[...])
        lat8 = jnp.dot(h, w2_ref[...], preferred_element_type=jnp.float32) + b2_ref[...]
        # hidden_loss = [mean || max || mae1(lat row0) || mae1(lat row1)] -> [nb, 144]
        hl_ref[...] = jnp.concatenate([mean, maxf, lat8[:nb], lat8[nb:]], axis=1)


def _atom_tile(n_total, nb, d):
    # Bound the per-tile working set: bf16 x block (double-buffered) plus the
    # [nb, tile] one-hot / iota temporaries used by the segment-sum matmul.
    per_row = 4 * d + 6 * nb + 8
    cap = (8 * 1024 * 1024) // max(per_row, 1)
    cap = max(256, (cap // 256) * 256)
    return int(min(2048, cap, _round_up(max(n_total, 1), 256)))


def build_hidden_losses(hidden_atom, batch_idx, lattice,
                        hidden_atom_1, batch_idx_1, lattice1,
                        mae_params, num_graphs):
    d = hidden_atom.shape[1]
    n_total = hidden_atom.shape[0] + hidden_atom_1.shape[0]
    nb = 2 * num_graphs
    tile = _atom_tile(n_total, nb, d)
    n_pad = _round_up(n_total, tile)

    # One concatenated atom stream (batch-1 graph ids offset by num_graphs), a
    # single tail pad, cast to bf16: one pass over the data at half the HBM bytes.
    x_all = jnp.concatenate([hidden_atom, hidden_atom_1], axis=0).astype(jnp.bfloat16)
    x_all = jnp.pad(x_all, ((0, n_pad - n_total), (0, 0)))
    idx_all = jnp.concatenate([batch_idx.astype(jnp.int32),
                               batch_idx_1.astype(jnp.int32) + num_graphs], axis=0)
    idx_all = jnp.pad(idx_all, (0, n_pad - n_total), constant_values=-1)
    idx_row = idx_all.reshape(1, n_pad)
    idx_col = idx_all.reshape(n_pad, 1)

    # lattice rows: [row0 of all 2B graphs ; row1 of all 2B graphs] -> [4B, 3]
    l0 = jnp.concatenate([lattice[:, 0, :], lattice1[:, 0, :]], axis=0)
    l1 = jnp.concatenate([lattice[:, 1, :], lattice1[:, 1, :]], axis=0)
    lat_rows = jnp.concatenate([l0, l1], axis=0).astype(jnp.float32)

    w1, b1, w2, b2 = mae_params
    nt = 2 * d + 16
    return pl.pallas_call(
        _hidden_loss_kernel,
        out_shape=jax.ShapeDtypeStruct((nb, nt), jnp.float32),
        grid_spec=pltpu.PrefetchScalarGridSpec(
            num_scalar_prefetch=0,
            grid=(n_pad // tile,),
            in_specs=[
                pl.BlockSpec((1, tile), lambda t: (0, t)),
                pl.BlockSpec((tile, 1), lambda t: (t, 0)),
                pl.BlockSpec((tile, d), lambda t: (t, 0)),
                pl.BlockSpec(lat_rows.shape, lambda t: (0, 0)),
                pl.BlockSpec(w1.shape, lambda t: (0, 0)),
                pl.BlockSpec(b1.shape, lambda t: (0, 0)),
                pl.BlockSpec(w2.shape, lambda t: (0, 0)),
                pl.BlockSpec(b2.shape, lambda t: (0, 0)),
            ],
            out_specs=pl.BlockSpec((nb, nt), lambda t: (0, 0)),
            scratch_shapes=[pltpu.VMEM((nb, d), jnp.float32),
                            pltpu.VMEM((nb, d), jnp.float32),
                            pltpu.VMEM((nb, 1), jnp.float32)]),
        compiler_params=pltpu.CompilerParams(
            dimension_semantics=("arbitrary",),
            vmem_limit_bytes=VMEM_LIMIT),
    )(idx_row, idx_col, x_all, lat_rows, w1, b1, w2, b2)


# -----------------------------------------------------------------------------
# Packed head parameters: every Linear of the train/eval heads is stored in one
# [R, NUM_TARGETS] f32 slab.  Each weight block has row-count equal to the width
# of the activation that feeds it (zero rows beyond fan_in, zero columns beyond
# fan_out), so the kernels can carry full-width 144-lane activations everywhere
# and never slice the lane dim of the slab.  Offsets are 8-aligned.
# -----------------------------------------------------------------------------
_HEAD_FIRST_WIDTH = {'in_emb': NUM_TARGETS, 'out_emb': 8, 'fc_out': 2 * NUM_TARGETS,
                     'fc_out_extend': NUM_TARGETS, 'fc_force': NUM_TARGETS}


def pack_head_params(raw):
    nt = NUM_TARGETS
    blocks, layout, off = [], {}, 0
    for name in ('in_emb', 'out_emb', 'fc_out', 'fc_out_extend', 'fc_force'):
        seq = raw[name]
        in_w = _HEAD_FIRST_WIDTH[name]
        entries = []
        for li in range(0, len(seq), 2):
            w, b = seq[li], seq[li + 1]
            fin, fout = w.shape
            rows = in_w
            assert rows % 8 == 0 and rows >= fin
            wp = jnp.zeros((rows, nt), jnp.float32).at[:fin, :fout].set(w)
            bp = jnp.zeros((8, nt), jnp.float32).at[:1, :fout].set(b)
            blocks.append(wp)
            blocks.append(bp)
            entries.append((off, rows, off + rows))
            off += rows + 8
            in_w = nt
        layout[name] = tuple(entries)
    return jnp.concatenate(blocks, axis=0), layout


def _packed_mlp(p_ref, layers, x):
    """Run a Sequential(Linear, LeakyReLU, ..., Linear) from the packed slab."""
    n = len(layers)
    for i, (w_off, w_rows, b_off) in enumerate(layers):
        w = p_ref[w_off:w_off + w_rows, :]               # static ref slice
        b = p_ref[b_off:b_off + 1, :]
        x = jnp.dot(x, w, preferred_element_type=jnp.float32) + b
        if i < n - 1:
            x = _leaky_relu(x)
    return x


# -----------------------------------------------------------------------------
# Kernel 2: fully fused train head (everything after hidden_loss is built).
# -----------------------------------------------------------------------------
def _train_head_kernel(hl_ref, bo_ref, e_ref, noise_ref, p_ref,
                       preds_ref, losses_ref, *, layout, dyn, eta):
    hl_all = hl_ref[...]                                 # [2B, 144]
    b = hl_all.shape[0] // 2
    hl, hl1 = hl_all[:b], hl_all[b:]

    # input_embedding_extend on BOTH graph batches with one stacked matmul.
    hid12 = _packed_mlp(p_ref, layout['in_emb'], hl_all)            # [2B, 144]
    hid1, hid2 = hid12[:b], hid12[b:]
    hout = _packed_mlp(p_ref, layout['out_emb'], bo_ref[...])       # [B, 144]

    # ---- CTL loss, matmul form (no [B,B,D] hard_keys / expand tensors) --------
    src = jnp.concatenate([hid1, hid2], axis=1)                     # [B, 288]
    trg = jnp.concatenate([hout, hout], axis=1)                     # [B, 288]

    def ctl_logits(q, k):
        qq = jnp.sum(q * q, axis=-1, keepdims=True)                 # [B,1]
        d_pos = jnp.sqrt(jnp.sum((q - k) ** 2, axis=-1, keepdims=True))
        qk = _dot_nt(q, k)                                          # [B,B] MXU
        kk_row = _dot_nt(jnp.ones((1, q.shape[1]), jnp.float32), k * k)   # [1,B]
        dneg = jnp.sqrt(jnp.maximum(qq + kk_row - 2.0 * qk, 0.0))
        lam = (d_pos / jnp.maximum(dneg, 1e-12)) ** dyn             # guarded divide
        hard = dneg > d_pos
        # logits[i,j] = q_i . hard_keys[i,j] = hard ? q.q + lam*(q.k - q.q) : q.k
        return jnp.where(hard, qq + lam * (qk - qq), qk)

    ii = lax.broadcasted_iota(jnp.int32, (b, b), 0)
    jj = lax.broadcasted_iota(jnp.int32, (b, b), 1)
    eye = (ii == jj).astype(jnp.float32)
    l_st = ctl_logits(src, trg)
    l_ts = ctl_logits(trg, src) + eye * (-1.0e9)
    logits = jnp.concatenate([l_st, l_ts], axis=1)                  # [B,2B]
    mx = jnp.max(logits, axis=-1, keepdims=True)
    lse = mx + jnp.log(jnp.sum(jnp.exp(logits - mx), axis=-1, keepdims=True))
    diag = jnp.sum(l_st * eye, axis=-1, keepdims=True)
    ctl = jnp.mean(lse - diag, keepdims=True)                       # (1,1)

    # ---- distances, per-row branch selection, THEN a single sampling pass -----
    d1 = jnp.sqrt(jnp.sum((hout - hid1) ** 2, axis=-1, keepdims=True))   # [B,1]
    d2 = jnp.sqrt(jnp.sum((hout - hid2) ** 2, axis=-1, keepdims=True))   # [B,1]
    c = d1 <= d2
    hid_sel = jnp.where(c, hid1, hid2)

    noise = noise_ref[...]                                          # [3B, 144]
    n0, n1, n2 = noise[:b], noise[b:2 * b], noise[2 * b:]
    bias = hout - hid_sel
    ab = jnp.abs(bias)
    mn = jnp.min(ab, axis=1, keepdims=True)
    mxv = jnp.max(ab, axis=1, keepdims=True)
    rng = mxv - mn
    w_r = (ab - mn) / jnp.where(rng > 0.0, rng, 1.0)                # guarded divide
    s0 = hid_sel + (n0 * w_r) * bias
    omega = eta * (n1 * w_r) + (1.0 - eta) * (s0 + n2)
    s1 = hid_sel + omega * bias
    xs = jnp.concatenate([s0, s1], axis=0)                          # [2B, 144]

    e = e_ref[...]                                                  # [B, 2]
    e_sel = jnp.where(c, e[:, 0:1], e[:, 1:2])
    tgt = jnp.concatenate([e_sel, e_sel], axis=0)                   # [2B, 1]

    pforce = _packed_mlp(p_ref, layout['fc_force'], xs)[:, 0:1]     # [2B, 1]
    # F.mse_loss(pred [2B,1], target [2B]) broadcasts to [2B,2B] in the reference;
    # reproduced in closed form: mean_{i,j}(p_i - t_j)^2.
    lf = (jnp.mean(pforce * pforce, keepdims=True)
          - 2.0 * jnp.mean(pforce, keepdims=True) * jnp.mean(tgt, keepdims=True)
          + jnp.mean(tgt * tgt, keepdims=True))                     # (1,1)

    pt = _packed_mlp(p_ref, layout['fc_out'],
                     jnp.concatenate([hl, hl1], axis=1))[:, 0:1]    # [B, 1]
    pe = _packed_mlp(p_ref, layout['fc_out_extend'], xs)[:, 0:1]    # [2B, 1]

    # col0 = pred_target; col1/col2 = pred_extend for sample 0 / sample 1
    preds_ref[...] = jnp.concatenate([pt, pe[:b], pe[b:]], axis=1)  # [B, 3]
    losses_ref[...] = jnp.concatenate([ctl, lf], axis=1)            # (1, 2)


def train_head(slab, layout, hl_all, batch_output, energy, energy1, noise,
               dynamic_coefficient, eta=0.8):
    b = batch_output.shape[0]
    bo = jnp.pad(batch_output.reshape(b, 1).astype(jnp.float32), ((0, 0), (0, 7)))
    e2 = jnp.stack([energy, energy1], axis=1).astype(jnp.float32)
    args = (hl_all, bo, e2, noise, slab)
    return pl.pallas_call(
        functools.partial(_train_head_kernel, layout=layout,
                          dyn=float(dynamic_coefficient), eta=float(eta)),
        out_shape=(jax.ShapeDtypeStruct((b, 3), jnp.float32),
                   jax.ShapeDtypeStruct((1, 2), jnp.float32)),
        in_specs=[_vmem_spec()] * len(args),
        out_specs=(_vmem_spec(), _vmem_spec()),
        compiler_params=pltpu.CompilerParams(vmem_limit_bytes=VMEM_LIMIT),
    )(*args)


# -----------------------------------------------------------------------------
# Kernel 3 (eval path): fused fc_out head on concat([hidden_loss, hidden_loss_1]).
# -----------------------------------------------------------------------------
def _fc_out_kernel(hl_ref, p_ref, out_ref, *, layout):
    hl_all = hl_ref[...]
    b = hl_all.shape[0] // 2
    x = jnp.concatenate([hl_all[:b], hl_all[b:]], axis=1)           # [B, 288]
    out_ref[...] = _packed_mlp(p_ref, layout['fc_out'], x)[:, 0:1]


def fc_out_head(slab, layout, hl_all):
    b = hl_all.shape[0] // 2
    return pl.pallas_call(
        functools.partial(_fc_out_kernel, layout=layout),
        out_shape=jax.ShapeDtypeStruct((b, 1), jnp.float32),
        in_specs=[_vmem_spec(), _vmem_spec()],
        out_specs=_vmem_spec(),
        compiler_params=pltpu.CompilerParams(vmem_limit_bytes=VMEM_LIMIT),
    )(hl_all, slab)


# -----------------------------------------------------------------------------
# Parameters (deterministic, torch-Linear-like uniform init) + packing
# -----------------------------------------------------------------------------
def linear_init(key, fan_in, fan_out):
    kw, kb = jax.random.split(key)
    bound = 1.0 / math.sqrt(fan_in)
    w = jax.random.uniform(kw, (fan_in, fan_out), jnp.float32, -bound, bound)
    b = jax.random.uniform(kb, (1, fan_out), jnp.float32, -bound, bound)
    return w, b


def init_params(key):
    ks = jax.random.split(key, 16)
    nt = NUM_TARGETS
    raw = {}
    raw['in_emb'] = linear_init(ks[2], nt, nt) + linear_init(ks[3], nt, nt)
    raw['out_emb'] = linear_init(ks[4], 1, nt) + linear_init(ks[5], nt, nt)
    raw['fc_out'] = (linear_init(ks[6], nt * 2, nt // 2)
                     + linear_init(ks[7], nt // 2, nt // 4)
                     + linear_init(ks[8], nt // 4, nt // 8)
                     + linear_init(ks[9], nt // 8, 1))
    raw['fc_out_extend'] = (linear_init(ks[10], nt, nt // 2)
                            + linear_init(ks[11], nt // 2, nt // 4)
                            + linear_init(ks[12], nt // 4, nt // 8)
                            + linear_init(ks[13], nt // 8, 1))
    raw['fc_force'] = (linear_init(ks[14], nt, nt // 2)
                       + linear_init(ks[15], nt // 2, 1))
    slab, layout = pack_head_params(raw)
    return {'mae1': linear_init(ks[0], 3, 32) + linear_init(ks[1], 32, 8),
            'head_slab': slab, 'head_layout': layout}


# -----------------------------------------------------------------------------
# get_samples noise (torch.normal is stochastic; drawn host-side with jax.random
# and consumed inside the fused train kernel; branch is selected before sampling,
# which is distributionally equivalent to the reference).
# -----------------------------------------------------------------------------
def _sample_noise(key, shape):
    k0, k1, k2 = jax.random.split(key, 3)
    return jnp.concatenate([jax.random.normal(k0, shape, jnp.float32),
                            jax.random.normal(k1, shape, jnp.float32),
                            jax.random.normal(k2, shape, jnp.float32)], axis=0)


# -----------------------------------------------------------------------------
# Forward pass
# -----------------------------------------------------------------------------
def finetune_ende_forward(params, hidden_atom, batch_idx, hidden_atom_1, batch_idx_1,
                          lattice, lattice1, batch_output, energy, energy1,
                          mode='train', dynamic_coefficient=0.9, sample_key=None):
    if sample_key is None:
        sample_key = jax.random.PRNGKey(1)
    b = batch_output.shape[0]

    # hl_all[:B] == hidden_loss (batch 0), hl_all[B:] == hidden_loss_1 (batch 1)
    hl_all = build_hidden_losses(hidden_atom, batch_idx, lattice,
                                 hidden_atom_1, batch_idx_1, lattice1,
                                 params['mae1'], b)                  # [2B, 144]

    if mode in ('train', 'val'):
        nt = hl_all.shape[1]
        noise = _sample_noise(sample_key, (b, nt))                   # [3B, nt]
        preds, losses = train_head(params['head_slab'], params['head_layout'],
                                   hl_all, batch_output, energy, energy1,
                                   noise, dynamic_coefficient)
        pred_target = preds[:, 0]                                    # [B]
        pred_extend = preds[:, 1:3].reshape(-1)                      # [2B] (b, sample)
        pred = jnp.concatenate([pred_target, pred_extend], axis=0)
        x_size = 2
        target_extend = jnp.repeat(batch_output, x_size)
        target = jnp.concatenate([batch_output, target_extend], axis=0)
        return pred, target, losses[0, 0], pred_target, losses[0, 1]
    else:
        pred_target = fc_out_head(params['head_slab'], params['head_layout'],
                                  hl_all).reshape(-1)
        return pred_target, 0, 0, pred_target, 0


if __name__ == "__main__":
    key = jax.random.PRNGKey(0)
    k_data, k_param, k_sample = jax.random.split(key, 3)
    dk = jax.random.split(k_data, 8)

    B, ATOMS, EMB = 4, 16, 64
    hidden_atom = jax.random.normal(dk[0], (ATOMS, EMB), jnp.float32)     # encoder output (graph 0)
    hidden_atom_1 = jax.random.normal(dk[1], (ATOMS, EMB), jnp.float32)   # encoder output (graph 1)
    batch_idx = jnp.repeat(jnp.arange(B, dtype=jnp.int32), ATOMS // B)
    batch_idx_1 = jnp.repeat(jnp.arange(B, dtype=jnp.int32), ATOMS // B)
    # scaled_lattice_tensor: [B, 2, 3] so MaskedAutoencoder1 output flattens to 16
    lattice = jax.random.normal(dk[2], (B, 2, 3), jnp.float32)
    lattice1 = jax.random.normal(dk[3], (B, 2, 3), jnp.float32)
    batch_output = jax.random.normal(dk[4], (B,), jnp.float32)
    energy = jax.random.normal(dk[5], (B,), jnp.float32)
    energy1 = jax.random.normal(dk[6], (B,), jnp.float32)

    params = init_params(k_param)

    out = finetune_ende_forward(params, hidden_atom, batch_idx, hidden_atom_1,
                                batch_idx_1, lattice, lattice1, batch_output,
                                energy, energy1, mode='train',
                                dynamic_coefficient=0.9, sample_key=k_sample)
    jax.block_until_ready(out)
    pred, target, loss, test_output, loss_force = out
    assert pred.shape == (3 * B,) and target.shape == (3 * B,)
    assert test_output.shape == (B,)
    assert bool(jnp.all(jnp.isfinite(pred)))
    assert bool(jnp.isfinite(loss)) and bool(jnp.isfinite(loss_force))

    pred_eval, _, _, _, _ = finetune_ende_forward(
        params, hidden_atom, batch_idx, hidden_atom_1, batch_idx_1,
        lattice, lattice1, batch_output, energy, energy1, mode='test')
    jax.block_until_ready(pred_eval)
    assert pred_eval.shape == (B,)
    assert bool(jnp.all(jnp.isfinite(pred_eval)))
    print("KERNEL_OK")
</pallas_src>

<mosaic_0001>
module attributes {stable_mosaic.version = 11 : i64} {
  func.func @_hidden_loss_kernel(%arg0: i32, %arg1: memref<1x256xi32, #tpu.memory_space<vmem>>, %arg2: memref<256x1xi32, #tpu.memory_space<vmem>>, %arg3: memref<256x64xbf16, #tpu.memory_space<vmem>>, %arg4: memref<16x3xf32, #tpu.memory_space<vmem>>, %arg5: memref<3x32xf32, #tpu.memory_space<vmem>>, %arg6: memref<1x32xf32, #tpu.memory_space<vmem>>, %arg7: memref<32x8xf32, #tpu.memory_space<vmem>>, %arg8: memref<1x8xf32, #tpu.memory_space<vmem>>, %arg9: memref<8x144xf32, #tpu.memory_space<vmem>>, %arg10: memref<8x64xf32, #tpu.memory_space<vmem>>, %arg11: memref<8x64xf32, #tpu.memory_space<vmem>>, %arg12: memref<8x1xf32, #tpu.memory_space<vmem>>) attributes {dimension_semantics = [#tpu.dimension_semantics<arbitrary>], iteration_bounds = array<i64: 1>, scalar_prefetch = 0 : i64, scratch_operands = 3 : i64, tpu.core_type = #tpu.core_type<tc>, window_params = [{transform_indices = @transform_0, window_bounds = array<i64: 1, 256>}, {transform_indices = @transform_1, window_bounds = array<i64: 256, 1>}, {transform_indices = @transform_2, window_bounds = array<i64: 256, 64>}, {pipeline_mode = #tpu.pipeline_mode<synchronous>, transform_indices = @transform_3, window_bounds = array<i64: 16, 3>}, {pipeline_mode = #tpu.pipeline_mode<synchronous>, transform_indices = @transform_4, window_bounds = array<i64: 3, 32>}, {pipeline_mode = #tpu.pipeline_mode<synchronous>, transform_indices = @transform_5, window_bounds = array<i64: 1, 32>}, {pipeline_mode = #tpu.pipeline_mode<synchronous>, transform_indices = @transform_6, window_bounds = array<i64: 32, 8>}, {pipeline_mode = #tpu.pipeline_mode<synchronous>, transform_indices = @transform_7, window_bounds = array<i64: 1, 8>}, {pipeline_mode = #tpu.pipeline_mode<synchronous>, transform_indices = @transform_8, window_bounds = array<i64: 8, 144>}]} {
    %c0_i32 = arith.constant 0 : i32
    %0 = arith.cmpi eq, %arg0, %c0_i32 : i32
    %1 = arith.extui %0 : i1 to i32
    %c0_i32_0 = arith.constant 0 : i32
    %2 = arith.cmpi ne, %1, %c0_i32_0 : i32
    scf.if %2 {
      %cst_21 = arith.constant 0.000000e+00 : f32
      %25 = vector.broadcast %cst_21 : f32 to vector<8x64xf32>
      %c0_22 = arith.constant 0 : index
      %c0_23 = arith.constant 0 : index
      %26 = vector.load %arg10[%c0_22, %c0_23] : memref<8x64xf32, #tpu.memory_space<vmem>>, vector<8x64xf32>
      tpu.vector_store %arg10[%c0_22, %c0_23], %25 {strides = array<i32>} : memref<8x64xf32, #tpu.memory_space<vmem>>, vector<8x64xf32>,
      %cst_24 = arith.constant 0.000000e+00 : f32
      %27 = vector.broadcast %cst_24 : f32 to vector<8x1xf32>
      %c0_25 = arith.constant 0 : index
      %c0_26 = arith.constant 0 : index
      %28 = vector.load %arg12[%c0_25, %c0_26] : memref<8x1xf32, #tpu.memory_space<vmem>>, vector<8x1xf32>
      tpu.vector_store %arg12[%c0_25, %c0_26], %27 {strides = array<i32>} : memref<8x1xf32, #tpu.memory_space<vmem>>, vector<8x1xf32>,
      %cst_27 = arith.constant -3.40282347E+38 : f32
      %29 = vector.broadcast %cst_27 : f32 to vector<8x64xf32>
      %c0_28 = arith.constant 0 : index
      %c0_29 = arith.constant 0 : index
      %30 = vector.load %arg11[%c0_28, %c0_29] : memref<8x64xf32, #tpu.memory_space<vmem>>, vector<8x64xf32>
      tpu.vector_store %arg11[%c0_28, %c0_29], %29 {strides = array<i32>} : memref<8x64xf32, #tpu.memory_space<vmem>>, vector<8x64xf32>,
    } else {
    }
    %c0 = arith.constant 0 : index
    %c0_1 = arith.constant 0 : index
    %3 = vector.load %arg3[%c0, %c0_1] : memref<256x64xbf16, #tpu.memory_space<vmem>>, vector<256x64xbf16>
    %c0_2 = arith.constant 0 : index
    %c0_3 = arith.constant 0 : index
    %4 = vector.load %arg1[%c0_2, %c0_3] : memref<1x256xi32, #tpu.memory_space<vmem>>, vector<1x256xi32>
    %c0_4 = arith.constant 0 : index
    %c0_5 = arith.constant 0 : index
    %5 = vector.load %arg2[%c0_4, %c0_5] : memref<256x1xi32, #tpu.memory_space<vmem>>, vector<256x1xi32>
    %6 = tpu.iota {dimensions = array<i32: 0>} : vector<8x256xi32>
    %7 = vector.broadcast %4 : vector<1x256xi32> to vector<8x256xi32>
    %8 = arith.cmpi eq, %6, %7 : vector<8x256xi32>
    %9 = arith.extui %8 : vector<8x256xi1> to vector<8x256xi32>
    %10 = arith.sitofp %9 : vector<8x256xi32> to vector<8x256xf32>
    %11 = arith.truncf %10 : vector<8x256xf32> to vector<8x256xbf16>
    %c0_6 = arith.constant 0 : index
    %c0_7 = arith.constant 0 : index
    %12 = vector.load %arg10[%c0_6, %c0_7] : memref<8x64xf32, #tpu.memory_space<vmem>>, vector<8x64xf32>
    %cst = arith.constant dense<0.000000e+00> : vector<8x64xf32>
    %13 = tpu.matmul %11, %3, %cst {dimension_numbers = #tpu.dot_dimension_numbers<[1], [0], [0], [1], [0, 0, 1, 1], [], []>} : vector<8x256xbf16>, vector<256x64xbf16>, vector<8x64xf32> -> vector<8x64xf32>
    %14 = arith.addf %12, %13 : vector<8x64xf32>
    %c0_8 = arith.constant 0 : index
    %c0_9 = arith.constant 0 : index
    %15 = vector.load %arg10[%c0_8, %c0_9] : memref<8x64xf32, #tpu.memory_space<vmem>>, vector<8x64xf32>
    tpu.vector_store %arg10[%c0_8, %c0_9], %14 {strides = array<i32>} : memref<8x64xf32, #tpu.memory_space<vmem>>, vector<8x64xf32>,
    %cst_10 = arith.constant 1.000000e+00 : bf16
    %16 = vector.broadcast %cst_10 : bf16 to vector<256x1xbf16>
    %c0_11 = arith.constant 0 : index
    %c0_12 = arith.constant 0 : index
    %17 = vector.load %arg12[%c0_11, %c0_12] : memref<8x1xf32, #tpu.memory_space<vmem>>, vector<8x1xf32>
    %cst_13 = arith.constant dense<0.000000e+00> : vector<8x1xf32>
    %18 = tpu.matmul %11, %16, %cst_13 {dimension_numbers = #tpu.dot_dimension_numbers<[1], [0], [0], [1], [0, 0, 1, 1], [], []>} : vector<8x256xbf16>, vector<256x1xbf16>, vector<8x1xf32> -> vector<8x1xf32>
    %19 = arith.addf %17, %18 : vector<8x1xf32>
    %c0_14 = arith.constant 0 : index
    %c0_15 = arith.constant 0 : index
    %20 = vector.load %arg12[%c0_14, %c0_15] : memref<8x1xf32, #tpu.memory_space<vmem>>, vector<8x1xf32>
    tpu.vector_store %arg12[%c0_14, %c0_15], %19 {strides = array<i32>} : memref<8x1xf32, #tpu.memory_space<vmem>>, vector<8x1xf32>,
    %cst_16 = arith.constant -3.389530e+38 : bf16
    %c0_i32_17 = arith.constant 0 : i32
    %c8_i32 = arith.constant 8 : i32
    %21 = arith.addi %c0_i32_17, %c8_i32 : i32
    %c1_i32 = arith.constant 1 : i32
    scf.for %arg13 = %c0_i32_17 to %21 step %c1_i32  : i32 {
      %c1_i32_21 = arith.constant 1 : i32
      %25 = arith.muli %arg13, %c1_i32_21 : i32
      %c0_i32_22 = arith.constant 0 : i32
      %26 = arith.addi %c0_i32_22, %25 : i32
      %27 = vector.broadcast %26 : i32 to vector<256x1xi32>
      %28 = arith.cmpi eq, %5, %27 : vector<256x1xi32>
      %29 = vector.shape_cast %28 : vector<256x1xi1> to vector<256x1xi1>
      %30 = vector.broadcast %29 : vector<256x1xi1> to vector<256x64xi1>
      %31 = vector.broadcast %cst_16 : bf16 to vector<256x64xbf16>
      %32 = arith.select %30, %3, %31 : vector<256x64xi1>, vector<256x64xbf16>
      %cst_23 = arith.constant dense<0xFF80> : vector<64xbf16>
      %33 = vector.multi_reduction <maximumf>, %32, %cst_23 [0] : vector<256x64xbf16> to vector<64xbf16>
      %34 = vector.shape_cast %33 : vector<64xbf16> to vector<1x64xbf16>
      %35 = arith.extf %34 : vector<1x64xbf16> to vector<1x64xf32>
      %36 = arith.index_cast %26 : i32 to index
      %c0_24 = arith.constant 0 : index
      %37 = vector.load %arg11[%36, %c0_24] : memref<8x64xf32, #tpu.memory_space<vmem>>, vector<1x64xf32>
      %38 = arith.maximumf %37, %35 : vector<1x64xf32>
      %39 = arith.index_cast %26 : i32 to index
      %c0_25 = arith.constant 0 : index
      %40 = vector.load %arg11[%39, %c0_25] : memref<8x64xf32, #tpu.memory_space<vmem>>, vector<1x64xf32>
      tpu.vector_store %arg11[%39, %c0_25], %38 {strides = array<i32>} : memref<8x64xf32, #tpu.memory_space<vmem>>, vector<1x64xf32>,
    }
    %c8_i32_18 = arith.constant 8 : i32
    %c0_i32_19 = arith.constant 0 : i32
    %22 = arith.cmpi eq, %arg0, %c0_i32_19 : i32
    %23 = arith.extui %22 : i1 to i32
    %c0_i32_20 = arith.constant 0 : i32
    %24 = arith.cmpi ne, %23, %c0_i32_20 : i32
    scf.if %24 {
      %c0_21 = arith.constant 0 : index
      %c0_22 = arith.constant 0 : index
      %25 = vector.load %arg12[%c0_21, %c0_22] : memref<8x1xf32, #tpu.memory_space<vmem>>, vector<8x1xf32>
      %c0_23 = arith.constant 0 : index
      %c0_24 = arith.constant 0 : index
      %26 = vector.load %arg10[%c0_23, %c0_24] : memref<8x64xf32, #tpu.memory_space<vmem>>, vector<8x64xf32>
      %cst_25 = arith.constant 1.000000e+00 : f32
      %27 = vector.broadcast %cst_25 : f32 to vector<8x1xf32>
      %28 = arith.maximumf %25, %27 : vector<8x1xf32>
      %29 = vector.broadcast %28 : vector<8x1xf32> to vector<8x64xf32>
      %30 = arith.divf %26, %29 : vector<8x64xf32>
      %cst_26 = arith.constant 0.000000e+00 : f32
      %31 = vector.broadcast %cst_26 : f32 to vector<8x1xf32>
      %32 = arith.cmpf ogt, %25, %31 : vector<8x1xf32>
      %c0_27 = arith.constant 0 : index
      %c0_28 = arith.constant 0 : index
      %33 = vector.load %arg11[%c0_27, %c0_28] : memref<8x64xf32, #tpu.memory_space<vmem>>, vector<8x64xf32>
      %cst_29 = arith.constant 0.000000e+00 : f32
      %34 = vector.shape_cast %32 : vector<8x1xi1> to vector<8x1xi1>
      %35 = vector.broadcast %34 : vector<8x1xi1> to vector<8x64xi1>
      %36 = vector.broadcast %cst_29 : f32 to vector<8x64xf32>
      %37 = arith.select %35, %33, %36 : vector<8x64xi1>, vector<8x64xf32>
      %c0_30 = arith.constant 0 : index
      %c0_31 = arith.constant 0 : index
      %38 = vector.load %arg4[%c0_30, %c0_31] : memref<16x3xf32, #tpu.memory_space<vmem>>, vector<16x3xf32>
      %c0_32 = arith.constant 0 : index
      %c0_33 = arith.constant 0 : index
      %39 = vector.load %arg5[%c0_32, %c0_33] : memref<3x32xf32, #tpu.memory_space<vmem>>, vector<3x32xf32>
      %cst_34 = arith.constant dense<0.000000e+00> : vector<16x32xf32>
      %40 = tpu.matmul %38, %39, %cst_34 {dimension_numbers = #tpu.dot_dimension_numbers<[1], [0], [0], [1], [0, 0, 1, 1], [], []>} : vector<16x3xf32>, vector<3x32xf32>, vector<16x32xf32> -> vector<16x32xf32>
      %c0_35 = arith.constant 0 : index
      %c0_36 = arith.constant 0 : index
      %41 = vector.load %arg6[%c0_35, %c0_36] : memref<1x32xf32, #tpu.memory_space<vmem>>, vector<1x32xf32>
      %42 = vector.broadcast %41 : vector<1x32xf32> to vector<16x32xf32>
      %43 = arith.addf %40, %42 : vector<16x32xf32>
      %cst_37 = arith.constant 0.000000e+00 : f32
      %44 = vector.broadcast %cst_37 : f32 to vector<16x32xf32>
      %45 = arith.cmpf ogt, %43, %44 : vector<16x32xf32>
      %cst_38 = arith.constant 0.00999999977 : f32
      %46 = vector.broadcast %cst_38 : f32 to vector<16x32xf32>
      %47 = arith.mulf %46, %43 : vector<16x32xf32>
      %48 = arith.select %45, %43, %47 : vector<16x32xi1>, vector<16x32xf32>
      %c0_39 = arith.constant 0 : index
      %c0_40 = arith.constant 0 : index
      %49 = vector.load %arg7[%c0_39, %c0_40] : memref<32x8xf32, #tpu.memory_space<vmem>>, vector<32x8xf32>
      %cst_41 = arith.constant dense<0.000000e+00> : vector<16x8xf32>
      %50 = tpu.matmul %48, %49, %cst_41 {dimension_numbers = #tpu.dot_dimension_numbers<[1], [0], [0], [1], [0, 0, 1, 1], [], []>} : vector<16x32xf32>, vector<32x8xf32>, vector<16x8xf32> -> vector<16x8xf32>
      %c0_42 = arith.constant 0 : index
      %c0_43 = arith.constant 0 : index
      %51 = vector.load %arg8[%c0_42, %c0_43] : memref<1x8xf32, #tpu.memory_space<vmem>>, vector<1x8xf32>
      %52 = vector.broadcast %51 : vector<1x8xf32> to vector<16x8xf32>
      %53 = arith.addf %50, %52 : vector<16x8xf32>
      %54 = vector.extract_strided_slice %53 {offsets = [0, 0], sizes = [8, 8], strides = [1, 1]} : vector<16x8xf32> to vector<8x8xf32>
      %55 = vector.extract_strided_slice %53 {offsets = [8, 0], sizes = [8, 8], strides = [1, 1]} : vector<16x8xf32> to vector<8x8xf32>
      %56 = tpu.concatenate %30, %37, %54, %55 in 1 : vector<8x64xf32>, vector<8x64xf32>, vector<8x8xf32>, vector<8x8xf32> -> vector<8x144xf32>
      %c0_44 = arith.constant 0 : index
      %c0_45 = arith.constant 0 : index
      %57 = vector.load %arg9[%c0_44, %c0_45] : memref<8x144xf32, #tpu.memory_space<vmem>>, vector<8x144xf32>
      tpu.vector_store %arg9[%c0_44, %c0_45], %56 {strides = array<i32>} : memref<8x144xf32, #tpu.memory_space<vmem>>, vector<8x144xf32>,
    } else {
    }
    return
  }
  func.func @transform_0(%arg0: i32) -> (i32, i32) {
    %c0_i32 = arith.constant 0 : i32
    %c0_i32_0 = arith.constant 0 : i32
    return %c0_i32, %arg0 : i32, i32
  }
  func.func @transform_1(%arg0: i32) -> (i32, i32) {
    %c0_i32 = arith.constant 0 : i32
    %c0_i32_0 = arith.constant 0 : i32
    return %arg0, %c0_i32 : i32, i32
  }
  func.func @transform_2(%arg0: i32) -> (i32, i32) {
    %c0_i32 = arith.constant 0 : i32
    %c0_i32_0 = arith.constant 0 : i32
    return %arg0, %c0_i32 : i32, i32
  }
  func.func @transform_3(%arg0: i32) -> (i32, i32) {
    %c0_i32 = arith.constant 0 : i32
    %c0_i32_0 = arith.constant 0 : i32
    %c0_i32_1 = arith.constant 0 : i32
    return %c0_i32, %c0_i32_0 : i32, i32
  }
  func.func @transform_4(%arg0: i32) -> (i32, i32) {
    %c0_i32 = arith.constant 0 : i32
    %c0_i32_0 = arith.constant 0 : i32
    %c0_i32_1 = arith.constant 0 : i32
    return %c0_i32, %c0_i32_0 : i32, i32
  }
  func.func @transform_5(%arg0: i32) -> (i32, i32) {
    %c0_i32 = arith.constant 0 : i32
    %c0_i32_0 = arith.constant 0 : i32
    %c0_i32_1 = arith.constant 0 : i32
    return %c0_i32, %c0_i32_0 : i32, i32
  }
  func.func @transform_6(%arg0: i32) -> (i32, i32) {
    %c0_i32 = arith.constant 0 : i32
    %c0_i32_0 = arith.constant 0 : i32
    %c0_i32_1 = arith.constant 0 : i32
    return %c0_i32, %c0_i32_0 : i32, i32
  }
  func.func @transform_7(%arg0: i32) -> (i32, i32) {
    %c0_i32 = arith.constant 0 : i32
    %c0_i32_0 = arith.constant 0 : i32
    %c0_i32_1 = arith.constant 0 : i32
    return %c0_i32, %c0_i32_0 : i32, i32
  }
  func.func @transform_8(%arg0: i32) -> (i32, i32) {
    %c0_i32 = arith.constant 0 : i32
    %c0_i32_0 = arith.constant 0 : i32
    %c0_i32_1 = arith.constant 0 : i32
    return %c0_i32, %c0_i32_0 : i32, i32
  }
}

</mosaic_0001>

<bundles_post_ra>
// kernel: tpu_custom_call.1
= control target key start
LH: loop header
LB: loop body
LE: loop exit
PB: predicated region body
PF: predicated region fallthrough
CT: control target
= control target key end

     0   :  { %13 = vsyncpa [#allocation6], 0  ;;  %v1169_v1 = vmov 1065369472   ;;  %v108_v36 = vlaneseq  ;;  %vm40_vm4 = vcmask 7168   ;;  %vm1996_vm5 = vcmask 523264   ;;  %s1971_s0 = inlined_call_operand.vmem [shape: s32[1,256], index: 0, kind: input, shape index: {}]   ;;  %s1972_s1 = inlined_call_operand.vmem [shape: s32[256,1], index: 1, kind: input, shape index: {}]   ;;  %s1973_s2 = inlined_call_operand.vmem [shape: bf16[256,64], index: 2, kind: input, shape index: {}]   ;;  %s1974_s3 = inlined_call_operand.vmem [shape: f32[16,3], index: 3, kind: input, shape index: {}]   ;;  %s1975_s4 = inlined_call_operand.vmem [shape: f32[3,32], index: 4, kind: input, shape index: {}]   ;;  %s1976_s5 = inlined_call_operand.vmem [shape: f32[1,32], index: 5, kind: input, shape index: {}]   ;;  %s1977_s6 = inlined_call_operand.vmem [shape: f32[32,8], index: 6, kind: input, shape index: {}]   ;;  %s1978_s7 = inlined_call_operand.vmem [shape: f32[1,8], index: 7, kind: input, shape index: {}]   ;;  %s1979_s8 = inlined_call_operand.hbm [shape: f32[8,144], index: 8, kind: output, shape index: {}]  }
   0x1   :  { %v1226_v0 = vld [vmem:[%s1973_s2 + $0x78] sm:$0xf]  ;;  %1054 = vmatprep.subr.bf16.mxu1 %v1169_v1  ;;  %v1232_v2 = vld [vmem:[%s1973_s2 + $0x7c] sm:$0xf]  ;;  %v1237_v3 = vld [vmem:[%s1972_s1] sm:$0xff] }
   0x2   :  { %1999 = vst [vmem:[#allocation8_spill] sm:$0xff] %v1226_v0  ;;  %2000 = vst [vmem:[#allocation9_spill] sm:$0xff] %v1232_v2  ;;  %v1242_v4 = vld [vmem:[%s1972_s1 + $0x8] sm:$0xff]  ;;  %1055 = vmatpush3.bf16.msra.mxu1 %v1169_v1  ;;  %v1248_v5 = vld [vmem:[%s1972_s1 + $0x10] sm:$0xff]  ;;  %v1000_v8 = vcombine.low %v1226_v0, %v1232_v2  ;;  %v109_v48 = vshrl.u32 %v108_v36, 7 }
   0x3   :  { %2001 = vst [vmem:[#allocation10_spill] sm:$0xff] %v1237_v3  ;;  %2002 = vst [vmem:[#allocation11_spill] sm:$0xff] %v1242_v4  ;;  %v1253_v6 = vld [vmem:[%s1972_s1 + $0x18] sm:$0xff]  ;;  %v1258_v7 = vld [vmem:[%s1972_s1 + $0x20] sm:$0xff]  ;;  %1056 = vmatprep.subr.bf16.mxu1 %v1169_v1 }
   0x4   :  { %2003 = vst [vmem:[#allocation12_spill] sm:$0xff] %v1248_v5  ;;  %2004 = vst [vmem:[#allocation13_spill] sm:$0xff] %v1253_v6  ;;  %v1265_v9 = vld [vmem:[%s1972_s1 + $0x28] sm:$0xff]  ;;  %v1270_v10 = vld [vmem:[%s1972_s1 + $0x30] sm:$0xff]  ;;  %1032 = vmatprep.subr.bf16.mxu0 %v1000_v8  ;;  %v112_v55 = vsub.s32 0, %v109_v48  ;;  %v116_v56 = vsub.s32 1, %v109_v48 }
   0x5   :  { %2005 = vst [vmem:[#allocation14_spill] sm:$0xff] %v1258_v7  ;;  %2006 = vst [vmem:[#allocation15_spill] sm:$0xff] %v1265_v9  ;;  %v1275_v11 = vld [vmem:[%s1972_s1 + $0x38] sm:$0xff]  ;;  %v1281_v12 = vld [vmem:[%s1972_s1 + $0x40] sm:$0xff] }
   0x6   :  { %2007 = vst [vmem:[#allocation16_spill] sm:$0xff] %v1270_v10  ;;  %2008 = vst [vmem:[#allocation17_spill] sm:$0xff] %v1275_v11  ;;  %v1286_v13 = vld [vmem:[%s1972_s1 + $0x48] sm:$0xff]  ;;  %v1291_v14 = vld [vmem:[%s1972_s1 + $0x50] sm:$0xff]  ;;  %1057 = vmatpush3.bf16.msra.mxu1 %v1169_v1 }
   0x7   :  { %2009 = vst [vmem:[#allocation18_spill] sm:$0xff] %v1281_v12  ;;  %2010 = vst [vmem:[#allocation19_spill] sm:$0xff] %v1286_v13  ;;  %v1296_v15 = vld [vmem:[%s1972_s1 + $0x58] sm:$0xff]  ;;  %v1301_v16 = vld [vmem:[%s1972_s1 + $0x60] sm:$0xff]  ;;  %1058 = vmatprep.subr.bf16.mxu1 %v1169_v1 }
   0x8   :  { %2011 = vst [vmem:[#allocation20_spill] sm:$0xff] %v1291_v14  ;;  %2012 = vst [vmem:[#allocation21_spill] sm:$0xff] %v1296_v15  ;;  %v1306_v17 = vld [vmem:[%s1972_s1 + $0x68] sm:$0xff]  ;;  %v1311_v18 = vld [vmem:[%s1972_s1 + $0x70] sm:$0xff] }
   0x9   :  { %2013 = vst [vmem:[#allocation22_spill] sm:$0xff] %v1301_v16  ;;  %2014 = vst [vmem:[#allocation23_spill] sm:$0xff] %v1306_v17  ;;  %v1316_v19 = vld [vmem:[%s1972_s1 + $0x78] sm:$0xff]  ;;  %v1321_v20 = vld [vmem:[%s1972_s1 + $0x80] sm:$0xff] }
   0xa   :  { %2015 = vst [vmem:[#allocation24_spill] sm:$0xff] %v1311_v18  ;;  %v1327_v21 = vld [vmem:[%s1972_s1 + $0x88] sm:$0xff]  ;;  %v1332_v22 = vld [vmem:[%s1972_s1 + $0x90] sm:$0xff]  ;;  %v1337_v23 = vld [vmem:[%s1972_s1 + $0x98] sm:$0xff]  ;;  %1059 = vmatpush3.bf16.msra.mxu1 %v1169_v1 }
   0xb   :  { %v1343_v24 = vld [vmem:[%s1972_s1 + $0xa0] sm:$0xff]  ;;  %v1348_v25 = vld [vmem:[%s1972_s1 + $0xa8] sm:$0xff]  ;;  %v1353_v26 = vld [vmem:[%s1972_s1 + $0xb0] sm:$0xff]  ;;  %1060 = vmatprep.subr.bf16.mxu1 %v1169_v1 }
   0xc   :  { %v1358_v27 = vld [vmem:[%s1972_s1 + $0xb8] sm:$0xff]  ;;  %v1363_v28 = vld [vmem:[%s1972_s1 + $0xc0] sm:$0xff]  ;;  %v1368_v29 = vld [vmem:[%s1972_s1 + $0xc8] sm:$0xff] }
   0xd   :  { %v1373_v30 = vld [vmem:[%s1972_s1 + $0xd0] sm:$0xff]  ;;  %v1378_v31 = vld [vmem:[%s1972_s1 + $0xd8] sm:$0xff]  ;;  %v1383_v32 = vld [vmem:[%s1972_s1 + $0xe0] sm:$0xff] }
   0xe   :  { %v1389_v33 = vld [vmem:[%s1972_s1 + $0xe8] sm:$0xff]  ;;  %v1394_v34 = vld [vmem:[%s1972_s1 + $0xf0] sm:$0xff]  ;;  %v1399_v35 = vld [vmem:[%s1972_s1 + $0xf8] sm:$0xff]  ;;  %1061 = vmatpush3.bf16.msra.mxu1 %v1169_v1 }
   0xf   :  { %v1405_v37 = vld [vmem:[%s1973_s2 + $0x38] sm:$0xf]  ;;  %v1410_v38 = vld [vmem:[%s1973_s2 + $0x3c] sm:$0xf]  ;;  %v1415_v39 = vld [vmem:[%s1973_s2 + $0x70] sm:$0xf]  ;;  %1062 = vmatprep.subr.bf16.mxu1 %v1169_v1 }
  0x10   :  { %2016 = vst [vmem:[#allocation25_spill] sm:$0xff] %v1415_v39  ;;  %v992_v40 = vcombine.low %v1405_v37, %v1410_v38  ;;  %v1422_v41 = vld [vmem:[%s1973_s2 + $0x74] sm:$0xf]  ;;  %v1427_v42 = vld [vmem:[%s1973_s2 + $0x30] sm:$0xf] }
  0x11   :  { %2017 = vst [vmem:[#allocation26_spill] sm:$0xff] %v1422_v41  ;;  %v1432_v43 = vld [vmem:[%s1973_s2 + $0x34] sm:$0xf]  ;;  %v999_v44 = vcombine.low %v1415_v39, %v1422_v41  ;;  %v1439_v45 = vld [vmem:[%s1973_s2 + $0x68] sm:$0xf] }
  0x12   :  { %2018 = vst [vmem:[#allocation27_spill] sm:$0xff] %v1439_v45  ;;  %v1444_v46 = vld [vmem:[%s1973_s2 + $0x6c] sm:$0xf]  ;;  %1033 = vmatpush3.bf16.msra.mxu0 %v992_v40  ;;  %v991_v47 = vcombine.low %v1427_v42, %v1432_v43  ;;  %v1455_v50 = vld [vmem:[%s1973_s2 + $0x28] sm:$0xf]  ;;  %1063 = vmatpush3.bf16.msra.mxu1 %v1169_v1 }
  0x13   :  { %2019 = vst [vmem:[#allocation28_spill] sm:$0xff] %v1444_v46  ;;  %1034 = vmatprep.subr.bf16.mxu0 %v999_v44  ;;  %v998_v49 = vcombine.low %v1439_v45, %v1444_v46  ;;  %v1460_v51 = vld [vmem:[%s1973_s2 + $0x2c] sm:$0xf]  ;;  %v1465_v52 = vld [vmem:[%s1973_s2 + $0x60] sm:$0xf]  ;;  %1064 = vmatprep.subr.bf16.mxu1 %v1169_v1 }
  0x14   :  { %2020 = vst [vmem:[#allocation29_spill] sm:$0xff] %v1465_v52  ;;  %v1470_v53 = vld [vmem:[%s1973_s2 + $0x64] sm:$0xf]  ;;  %v990_v54 = vcombine.low %v1455_v50, %v1460_v51  ;;  %v1481_v58 = vld [vmem:[%s1973_s2 + $0x20] sm:$0xf] }
  0x15   :  { %2021 = vst [vmem:[#allocation30_spill] sm:$0xff] %v1470_v53  ;;  %v997_v57 = vcombine.low %v1465_v52, %v1470_v53  ;;  %v1486_v59 = vld [vmem:[%s1973_s2 + $0x24] sm:$0xf]  ;;  %v1491_v60 = vld [vmem:[%s1973_s2 + $0x58] sm:$0xf] }
  0x16   :  { %1035 = vmatpush3.bf16.msra.mxu0 %v991_v47  ;;  %2022 = vst [vmem:[#allocation31_spill] sm:$0xff] %v1491_v60  ;;  %v1496_v61 = vld [vmem:[%s1973_s2 + $0x5c] sm:$0xf]  ;;  %1065 = vmatpush3.bf16.msra.mxu1 %v1169_v1  ;;  %v75_v62 = vld [vmem:[%s1971_s0] sm:$0x3]  ;;  %v989_v63 = vcombine.low %v1481_v58, %v1486_v59 }
  0x17   :  { %1036 = vmatprep.subr.bf16.mxu0 %v998_v49  ;;  %2023 = vst [vmem:[#allocation32_spill] sm:$0xff] %v1496_v61  ;;  %1066 = vmatprep.subr.bf16.mxu1 %v1169_v1  ;;  %v113_v8 = vrot.slane %v75_v62, %v112_v55  ;;  %v117_v36 = vrot.slane %v75_v62, %v116_v56  ;;  %v1510_v44 = vld [vmem:[%s1973_s2 + $0x18] sm:$0xf]  ;;  %v1515_v47 = vld [vmem:[%s1973_s2 + $0x1c] sm:$0xf] }
  0x18   :  { %v996_v40 = vcombine.low %v1491_v60, %v1496_v61  ;;  %v1520_v49 = vld [vmem:[%s1973_s2 + $0x50] sm:$0xf]  ;;  %v988_v55 = vcombine.low %v1510_v44, %v1515_v47  ;;  %v1541_v62 = vld [vmem:[%s1973_s2 + $0x14] sm:$0xf]  ;;  %v1565_v2 = vld [vmem:[%s1973_s2 + $0x8] sm:$0xf] }
  0x19   :  { %2024 = vst [vmem:[#allocation33_spill] sm:$0xff] %v1520_v49  ;;  %vm119_vm0 = vcmp.eq.s32.totalorder %v109_v48, %v117_v36  ;;  %vm118_vm2 = vcmp.eq.s32.totalorder %v109_v48, %v113_v8  ;;  %v1546_v48 = vld [vmem:[%s1973_s2 + $0x48] sm:$0xf]  ;;  %v1551_v8 = vld [vmem:[%s1973_s2 + $0x4c] sm:$0xf]  ;;  %2030 = vst [vmem:[#allocation37_spill] sm:$0xff] %v1565_v2 }
  0x1a   :  { %1037 = vmatpush3.bf16.msra.mxu0 %v990_v54  ;;  %v1525_v54 = vld [vmem:[%s1973_s2 + $0x54] sm:$0xf]  ;;  %1067 = vmatpush3.bf16.msra.mxu1 %v1169_v1  ;;  %vm1001_vm1 = vmpackc.low %vm119_vm0, %vm119_vm0  ;;  %2026 = vst [vmem:[#allocation35_spill] sm:$0xff] %v1546_v48  ;;  %v994_v0 = vcombine.low %v1546_v48, %v1551_v8  ;;  %v1591_v52 = vld [vmem:[%s1973_s2] sm:$0xf] }
  0x1b   :  { %1038 = vmatprep.subr.bf16.mxu0 %v997_v57  ;;  %2025 = vst [vmem:[#allocation34_spill] sm:$0xff] %v1525_v54  ;;  %1068 = vmatprep.subr.bf16.mxu1 %v1169_v1  ;;  %v995_v56 = vcombine.low %v1520_v49, %v1525_v54  ;;  %v1536_v57 = vld [vmem:[%s1973_s2 + $0x10] sm:$0xf]  ;;  %2027 = vst [vmem:[#allocation36_spill] sm:$0xff] %v1551_v8  ;;  %v1596_v53 = vld [vmem:[%s1973_s2 + $0x4] sm:$0xf] }
  0x1c   :  { %vm1554_vm3 = vmpackc.low %vm118_vm2, %vm118_vm2  ;;  %v1172_v45 = vmov -3.4028235e+38  }
  0x1d   :  { %42 = vst.msk [vmem:[#allocation3] sm:$0xff] %vm1996_vm5, %v1172_v45 }
  0x1e   :  { %1039 = vmatpush3.bf16.msra.mxu0 %v989_v63  ;;  %v1170_v63 = vmov 1.0|1.0   ;;  %1069 = vmatpush3.bf16.msra.mxu1 %v1169_v1  ;;  %v1570_v1 = vld [vmem:[%s1973_s2 + $0xc] sm:$0xf] }
  0x1f   :  { %1040 = vmatprep.subr.bf16.mxu0 %v996_v40  ;;  %1006 = vmatprep.mubr.msk.bf16.mxu1 %vm1001_vm1, %v1170_v63  ;;  %v987_v40 = vcombine.low %v1536_v57, %v1541_v62  ;;  %2031 = vst [vmem:[#allocation38_spill] sm:$0xff] %v1570_v1  ;;  %v986_v39 = vcombine.low %v1565_v2, %v1570_v1 }
  0x20   :  { %1002 = vmatprep.mubr.msk.bf16.mxu0 %vm1001_vm1, %v1170_v63 }
  0x21   :  { %1008 = vmatmul.mubr.msk.bf16.vlgmr.msra.gmra.mxu1 %vm1554_vm3, %v1170_v63 }
  0x22   :  { %1041 = vmatpush3.bf16.msra.mxu0 %v988_v55  ;;  %v1575_v55 = vld [vmem:[%s1973_s2 + $0x40] sm:$0xf] }
  0x23   :  { %1042 = vmatprep.subr.bf16.mxu0 %v995_v56  ;;  %2032 = vst [vmem:[#allocation39_spill] sm:$0xff] %v1575_v55  ;;  %v1580_v56 = vld [vmem:[%s1973_s2 + $0x44] sm:$0xf]  ;;  %s1605_s2 = smov 0  }
  0x24   :  { %2033 = vst [vmem:[#allocation40_spill] sm:$0xff] %v1580_v56  ;;  %v993_v41 = vcombine.low %v1575_v55, %v1580_v56 }
  0x26   :  { %1043 = vmatpush3.bf16.msra.mxu0 %v987_v40  ;;  %v985_v40 = vcombine.low %v1591_v52, %v1596_v53 }
  0x27   :  { %1044 = vmatprep.subr.bf16.mxu0 %v994_v0  ;;  %v1171_v0 = vmov 0.0  }
  0x28   :  { %41 = vst.msk [vmem:[#allocation4] sm:$0xff] %vm40_vm4, %v1171_v0 }
  0x29   :  { %39 = vst.msk [vmem:[#allocation2] sm:$0xff] %vm1996_vm5, %v1171_v0 }
  0x2a   :  { %1045 = vmatpush3.bf16.msra.mxu0 %v986_v39 }
  0x2b   :  { %1046 = vmatprep.subr.bf16.mxu0 %v993_v41 }
  0x2e   :  { %1047 = vmatpush3.bf16.msra.mxu0 %v985_v40 }
  0x2f   :  { %v266_v60 = vld [vmem:[#allocation4] sm:$0xff] }
  0x30   :  { %v126_v36 = vld [vmem:[#allocation2] sm:$0xff] }
  0x31   :  { %1004 = vmatmul.mubr.msk.bf16.vlgmr.msra.gmra.mxu0 %vm1554_vm3, %v1170_v63 }
  0xe1   :  { %v1070_v46 = vpop.f32.mrf.mxu1 }
  0xe3   :  { %v1071_v39 = vpop.f32.mrf.mxu1 }
  0xe4   :  { %v1072_v61 = vadd.f32 %v1071_v39, %v1070_v46 }
  0xe5   :  { %v1073_v49 = vpop.f32.mrf.mxu1 }
  0xe6   :  { %v307_v54 = vadd.f32 %v1072_v61, %v266_v60 }
  0xe7   :  { %v1074_v41 = vpop.f32.mrf.mxu1 }
  0xe8   :  { %309 = vst.msk [vmem:[#allocation4] sm:$0xff] %vm40_vm4, %v307_v54 }
  0xf1   :  { %v1048_v40 = vpop.f32.mrf.mxu0 }
  0xf3   :  { %v1049_v63 = vpop.f32.mrf.mxu0 }
  0xf4   :  { %v1050_v55 = vadd.f32 %v1049_v63, %v1048_v40 }
  0xf5   :  { %v1051_v56 = vpop.f32.mrf.mxu0 }
  0xf6   :  { %v263_v48 = vadd.f32 %v1050_v55, %v126_v36 }
  0xf7   :  { %v1052_v8 = vpop.f32.mrf.mxu0 }
  0xf8   :  { %265 = vst.msk [vmem:[#allocation2] sm:$0xff] %vm1996_vm5, %v263_v48 }
  0xf9 LB: > { %v1173_v45 = vmov 0   ;;  %v1613_v46 = vstv %s1167_s2  ;;  %v2034_v5 = vld [vmem:[#allocation12_spill] sm:$0xff]  ;;  %v2035_v3 = vld [vmem:[#allocation10_spill] sm:$0xff]  ;;  %v2036_v6 = vld [vmem:[#allocation13_spill] sm:$0xff]  ;;  %s728_s0 = scalar_lea.vmem [#allocation3], %s1167_s2  ;;  %s315_s2 = sadd.s32 1, %s1167_s2   ;;  %s1167_s2 = sphi %s1605_s2, %s315_s2  }
  0xfa   : > { %1135 = vset.pattern.permute.xlu1 %v1173_v45  ;;  %1134 = vset.pattern.permute.xlu0 %v1173_v45  ;;  %vm319_vm6 = vcmp.eq.s32.totalorder %v2034_v5, %v1613_v46  ;;  %vm317_vm7 = vcmp.eq.s32.totalorder %v2035_v3, %v1613_v46  ;;  %vm320_vm8 = vcmp.eq.s32.totalorder %v2036_v6, %v1613_v46  ;;  %v2037_v4 = vld [vmem:[#allocation11_spill] sm:$0xff]  ;;  %v2039_v7 = vld [vmem:[#allocation14_spill] sm:$0xff]  ;;  %v2040_v11 = vld [vmem:[#allocation17_spill] sm:$0xff]  ;;  %p312_p0 = scmp.ge.s32.totalorder %s315_s2, 8  }
  0xfb   : > { %vm318_vm9 = vcmp.eq.s32.totalorder %v2037_v4, %v1613_v46  ;;  %v351_v60 = vsel %vm319_vm6, 1, %v1173_v45  ;;  %v349_v61 = vsel %vm317_vm7, 1, %v1173_v45  ;;  %v352_v49 = vsel %vm320_vm8, 1, %v1173_v45  ;;  %v2038_v9 = vld [vmem:[#allocation15_spill] sm:$0xff]  ;;  %v2041_v10 = vld [vmem:[#allocation16_spill] sm:$0xff]  ;;  %v2043_v12 = vld [vmem:[#allocation18_spill] sm:$0xff] }
  0xfc   : > { %388 = vperm.xlu1 %1135, %v351_v60   ;;  %382 = vperm.xlu0 %1134, %v349_v61   ;;  %v350_v54 = vsel %vm318_vm9, 1, %v1173_v45  ;;  %vm322_vm10 = vcmp.eq.s32.totalorder %v2038_v9, %v1613_v46  ;;  %vm321_vm11 = vcmp.eq.s32.totalorder %v2039_v7, %v1613_v46  ;;  %vm324_vm12 = vcmp.eq.s32.totalorder %v2040_v11, %v1613_v46  ;;  %v2042_v13 = vld [vmem:[#allocation19_spill] sm:$0xff]  ;;  %v2044_v15 = vld [vmem:[#allocation21_spill] sm:$0xff]  ;;  %v2045_v14 = vld [vmem:[#allocation20_spill] sm:$0xff]  ;;  %s1175_s11 = smov (%p312_p0), 64   ;;  %s1176_s13 = smov (%p312_p0), 8  }
  0xfd   : > { %v354_v48 = vsel %vm322_vm10, 1, %v1173_v45  ;;  %v353_v8 = vsel %vm321_vm11, 1, %v1173_v45  ;;  %vm323_vm13 = vcmp.eq.s32.totalorder %v2041_v10, %v1613_v46  ;;  %v356_v55 = vsel %vm324_vm12, 1, %v1173_v45  ;;  %v2046_v17 = vld [vmem:[#allocation23_spill] sm:$0xff]  ;;  %v2047_v16 = vld [vmem:[#allocation22_spill] sm:$0xff]  ;;  %v2048_v18 = vld [vmem:[#allocation24_spill] sm:$0xff] }
  0xfe   : > { %v355_v56 = vsel %vm323_vm13, 1, %v1173_v45  ;;  %vm326_vm14 = vcmp.eq.s32.totalorder %v2042_v13, %v1613_v46  ;;  %vm325_vm15 = vcmp.eq.s32.totalorder %v2043_v12, %v1613_v46  ;;  %vm328_vm0 = vcmp.eq.s32.totalorder %v2044_v15, %v1613_v46  ;;  %v2067_v1 = vld [vmem:[#allocation38_spill] sm:$0xff]  ;;  %v2076_v2 = vld [vmem:[#allocation37_spill] sm:$0xff]  ;;  %s1177_s14 = smov (%p312_p0), [#allocation5]  }
  0xff   : > { %v358_v0 = vsel %vm326_vm14, 1, %v1173_v45  ;;  %v357_v39 = vsel %vm325_vm15, 1, %v1173_v45  ;;  %vm327_vm1 = vcmp.eq.s32.totalorder %v2045_v14, %v1613_v46  ;;  %v360_v41 = vsel %vm328_vm0, 1, %v1173_v45  ;;  %v2110_v14 = vld [vmem:[#allocation36_spill] sm:$0xff]  ;;  %s969_s15 = sshll.u32 (%p312_p0), %s1177_s14, 4  ;;  %s970_s15 = int_to_ptr.vmem [resolvable:$true] %s969_s15 }
 0x100   : > { %391 = vperm.xlu1 %1135, %v352_v49   ;;  %385 = vperm.xlu0 %1134, %v350_v54   ;;  %v359_v40 = vsel %vm327_vm1, 1, %v1173_v45  ;;  %vm330_vm2 = vcmp.eq.s32.totalorder %v2046_v17, %v1613_v46  ;;  %vm329_vm3 = vcmp.eq.s32.totalorder %v2047_v16, %v1613_v46  ;;  %vm332_vm4 = vcmp.eq.s32.totalorder %v1316_v19, %v1613_v46  ;;  %v2116_v17 = vld [vmem:[#allocation39_spill] sm:$0xff]  ;;  %s1139_s16 = scalar_lea.vmem (%p312_p0), %s970_s15, 256  ;;  %p1144_p2 = scmp.lt.s32.totalorder (%p312_p0), %s970_s15, %s970_s15 }
 0x101   : > { %v362_v36 = vsel %vm330_vm2, 1, %v1173_v45  ;;  %v361_v63 = vsel %vm329_vm3, 1, %v1173_v45  ;;  %vm331_vm6 = vcmp.eq.s32.totalorder %v2048_v18, %v1613_v46  ;;  %v364_v60 = vsel %vm332_vm4, 1, %v1173_v45  ;;  %p1140_p1 = scmp.ne.s32.totalorder (%p312_p0), %s970_s15, %s1139_s16  ;;  %p1145_p3 = scmp.lt.s32.totalorder (%p312_p0), %s1139_s16, %s1139_s16 }
 0x102   : > { %v363_v61 = vsel %vm331_vm6, 1, %v1173_v45  ;;  %vm334_vm7 = vcmp.eq.s32.totalorder %v1327_v21, %v1613_v46  ;;  %vm333_vm8 = vcmp.eq.s32.totalorder %v1321_v20, %v1613_v46  ;;  %vm336_vm9 = vcmp.eq.s32.totalorder %v1337_v23, %v1613_v46  ;;  %v859_v21 = vld [vmem:[%s1977_s6 + $0x18] sm:$0xff] (%p312_p0)  ;;  %v857_v23 = vld [vmem:[%s1977_s6 + $0x8] sm:$0xff] (%p312_p0) }
 0x103   : > { %v366_v49 = vsel %vm334_vm7, 1, %v1173_v45  ;;  %v365_v54 = vsel %vm333_vm8, 1, %v1173_v45  ;;  %vm335_vm10 = vcmp.eq.s32.totalorder %v1332_v22, %v1613_v46  ;;  %vm338_vm11 = vcmp.eq.s32.totalorder %v1348_v25, %v1613_v46  ;;  %1090 = vmatprep.subr.mxu1 (%p312_p0), %v859_v21  ;;  %v858_v22 = vld [vmem:[%s1977_s6 + $0x10] sm:$0xff] (%p312_p0)  ;;  %p1146_p4 = por (%p312_p0), %p1145_p3, %p1144_p2 }
 0x104   : > { %397 = vperm.xlu1 %1135, %v354_v48   ;;  %394 = vperm.xlu0 %1134, %v353_v8   ;;  %v368_v48 = vsel %vm336_vm9, 1, %v1173_v45  ;;  %v367_v8 = vsel %vm335_vm10, 1, %v1173_v45  ;;  %vm337_vm12 = vcmp.eq.s32.totalorder %v1343_v24, %v1613_v46  ;;  %vm340_vm13 = vcmp.eq.s32.totalorder %v1358_v27, %v1613_v46  ;;  %v856_v24 = vld [vmem:[%s1977_s6] sm:$0xff] (%p312_p0) }
 0x105   : > { %vm339_vm14 = vcmp.eq.s32.totalorder %v1353_v26, %v1613_v46  ;;  %vm342_vm15 = vcmp.eq.s32.totalorder %v1368_v29, %v1613_v46  ;;  %vm341_vm0 = vcmp.eq.s32.totalorder %v1363_v28, %v1613_v46  ;;  %vm344_vm1 = vcmp.eq.s32.totalorder %v1378_v31, %v1613_v46  ;;  %1091 = vmatpush3.msra.mxu1 (%p312_p0), %v859_v21  ;;  %v1025_v28 = vld [vmem:[%s1976_s5] ss:$0 sm:$0xff] (%p312_p0)  ;;  %p1147_p5 = pnand (%p312_p0), %p1146_p4, %p1140_p1 }
 0x106   : > { %vm343_vm2 = vcmp.eq.s32.totalorder %v1373_v30, %v1613_v46  ;;  %vm346_vm3 = vcmp.eq.s32.totalorder %v1389_v33, %v1613_v46  ;;  %vm345_vm4 = vcmp.eq.s32.totalorder %v1383_v32, %v1613_v46  ;;  %vm348_vm6 = vcmp.eq.s32.totalorder %v1399_v35, %v1613_v46  ;;  %1092 = vmatprep.subr.mxu1 (%p312_p0), %v858_v22 }
 0x107   : > { %vm347_vm7 = vcmp.eq.s32.totalorder %v1394_v34, %v1613_v46  ;;  %v2074_v7 = vmov 0  ;;  %v2079_v11 = vmov 0  ;;  %1093 = vmatpush3.msra.mxu1 (%p312_p0), %v858_v22 }
 0x108   : > { %403 = vperm.xlu1 %1135, %v356_v55   ;;  %400 = vperm.xlu0 %1134, %v355_v56   ;;  %v370_v55 = vsel %vm338_vm11, 1, %v1173_v45  ;;  %v369_v56 = vsel %vm337_vm12, 1, %v1173_v45 }
 0x109   :  { %1094 = vmatprep.subr.mxu1 (%p312_p0), %v857_v23 }
 0x10a   :  { %1095 = vmatpush3.msra.mxu1 (%p312_p0), %v857_v23 }
 0x10b   :  { %1096 = vmatprep.subr.mxu1 (%p312_p0), %v856_v24 }
 0x10c   : > { %409 = vperm.xlu1 %1135, %v358_v0   ;;  %406 = vperm.xlu0 %1134, %v357_v39   ;;  %v372_v0 = vsel %vm340_vm13, 1, %v1173_v45  ;;  %v371_v39 = vsel %vm339_vm14, 1, %v1173_v45 }
 0x10d   :  { %1097 = vmatpush3.msra.mxu1 (%p312_p0), %v856_v24 }
 0x110   : > { %415 = vperm.xlu1 %1135, %v360_v41   ;;  %412 = vperm.xlu0 %1134, %v359_v40   ;;  %v374_v41 = vsel %vm342_vm15, 1, %v1173_v45  ;;  %v373_v40 = vsel %vm341_vm0, 1, %v1173_v45 }
 0x114   : > { %421 = vperm.xlu1 %1135, %v362_v36   ;;  %418 = vperm.xlu0 %1134, %v361_v63   ;;  %v376_v36 = vsel %vm344_vm1, 1, %v1173_v45  ;;  %v375_v63 = vsel %vm343_vm2, 1, %v1173_v45 }
 0x118   : > { %427 = vperm.xlu1 %1135, %v364_v60   ;;  %424 = vperm.xlu0 %1134, %v363_v61   ;;  %v378_v60 = vsel %vm346_vm3, 1, %v1173_v45  ;;  %v377_v61 = vsel %vm345_vm4, 1, %v1173_v45 }
 0x11c   : > { %433 = vperm.xlu1 %1135, %v366_v49   ;;  %430 = vperm.xlu0 %1134, %v365_v54   ;;  %v380_v49 = vsel %vm348_vm6, 1, %v1173_v45  ;;  %v379_v54 = vsel %vm347_vm7, 1, %v1173_v45 }
 0x120   : > { %439 = vperm.xlu1 %1135, %v368_v48   ;;  %436 = vperm.xlu0 %1134, %v367_v8  }
 0x124   : > { %445 = vperm.xlu1 %1135, %v370_v55   ;;  %442 = vperm.xlu0 %1134, %v369_v56  }
 0x128   : > { %451 = vperm.xlu1 %1135, %v372_v0   ;;  %448 = vperm.xlu0 %1134, %v371_v39  }
 0x12c   : > { %457 = vperm.xlu1 %1135, %v374_v41   ;;  %454 = vperm.xlu0 %1134, %v373_v40  }
 0x130   : > { %463 = vperm.xlu1 %1135, %v376_v36   ;;  %460 = vperm.xlu0 %1134, %v375_v63  }
 0x134   : > { %469 = vperm.xlu1 %1135, %v378_v60   ;;  %466 = vperm.xlu0 %1134, %v377_v61  }
 0x138   : > { %475 = vperm.xlu1 %1135, %v380_v49   ;;  %472 = vperm.xlu0 %1134, %v379_v54  }
 0x177   : > { %v389_v48 = vpop.permute.xlu1 %388  ;;  %v383_v8 = vpop.permute.xlu0 %382 }
 0x178   : > { %vm479_vm8 = vcmp.eq.s32.totalorder %v389_v48, 1  ;;  %vm477_vm9 = vcmp.eq.s32.totalorder %v383_v8, 1  ;;  %v2057_v8 = vmov 0 }
 0x179   : > { %vm1711_vm11 = vmpackc.low %vm479_vm8, %vm479_vm8 }
 0x17a   : > { %vm1715_vm13 = vmpackc.low %vm477_vm9, %vm477_vm9  ;;  %v543_v9 = vsel %vm1711_vm11, %v2076_v2, 4286578559 }
 0x17b   : > { %v392_v55 = vpop.permute.xlu1 %391  ;;  %v386_v56 = vpop.permute.xlu0 %385  ;;  %v541_v48 = vsel %vm1715_vm13, %v1591_v52, 4286578559 }
 0x17c   : > { %vm480_vm10 = vcmp.eq.s32.totalorder %v392_v55, 1  ;;  %vm478_vm12 = vcmp.eq.s32.totalorder %v386_v56, 1  ;;  %v2059_v55 = vmov 0 }
 0x17d   : > { %vm1719_vm15 = vmpackc.low %vm480_vm10, %vm480_vm10 }
 0x17e   : > { %vm1723_vm1 = vmpackc.low %vm478_vm12, %vm478_vm12 }
 0x17f   : > { %v398_v0 = vpop.permute.xlu1 %397  ;;  %v395_v39 = vpop.permute.xlu0 %394 }
 0x180   : > { %vm482_vm14 = vcmp.eq.s32.totalorder %v398_v0, 1  ;;  %vm481_vm0 = vcmp.eq.s32.totalorder %v395_v39, 1 }
 0x181   : > { %vm1727_vm4 = vmpackc.low %vm482_vm14, %vm482_vm14 }
 0x182   : > { %v2058_v8 = vsel %vm1727_vm4, 4294967295, %v2057_v8  ;;  %vm1731_vm7 = vmpackc.low %vm481_vm0, %vm481_vm0 }
 0x183   : > { %v404_v41 = vpop.permute.xlu1 %403  ;;  %v401_v40 = vpop.permute.xlu0 %400  ;;  %v2060_v55 = vsel %vm1731_vm7, 4294967295, %v2059_v55 }
 0x184   : > { %vm484_vm8 = vcmp.eq.s32.totalorder %v404_v41, 1  ;;  %vm483_vm10 = vcmp.eq.s32.totalorder %v401_v40, 1  ;;  %v544_v41 = vsel %vm1719_vm15, %v2067_v1, 4286578559  ;;  %vm2082_vm11 = vnez %v2060_v55  ;;  %v2129_v40 = vld [vmem:[#allocation30_spill] sm:$0xff]  ;;  %v2130_v55 = vld [vmem:[#allocation29_spill] sm:$0xff] }
 0x185   : > { %vm1750_vm7 = vmpackc.low %vm484_vm8, %vm484_vm8  ;;  %v1010_v10 = vcombine.low %v543_v9, %v544_v41  ;;  %v545_v2 = vsel %vm2082_vm11, %v1536_v57, 4286578559  ;;  %v2085_v9 = vmov 0  ;;  %vm2091_vm11 = vcmask 523264  }
 0x187   : > { %v410_v36 = vpop.permute.xlu1 %409  ;;  %v407_v63 = vpop.permute.xlu0 %406 }
 0x188   : > { %vm486_vm2 = vcmp.eq.s32.totalorder %v410_v36, 1  ;;  %vm485_vm3 = vcmp.eq.s32.totalorder %v407_v63, 1 }
 0x189   : > { %vm1735_vm12 = vmpackc.low %vm486_vm2, %vm486_vm2 }
 0x18a   : > { %vm1739_vm5 = vmpackc.low %vm485_vm3, %vm485_vm3 }
 0x18b   : > { %v416_v3 = vpop.permute.xlu1 %415  ;;  %v413_v46 = vpop.permute.xlu0 %412 }
 0x18c   : > { %vm488_vm6 = vcmp.eq.s32.totalorder %v416_v3, 1  ;;  %vm487_vm9 = vcmp.eq.s32.totalorder %v413_v46, 1  ;;  %v2065_v3 = vmov 0  ;;  %v542_v46 = vsel %vm1723_vm1, %v1596_v53, 4286578559 }
 0x18d   : > { %vm1743_vm4 = vmpackc.low %vm488_vm6, %vm488_vm6  ;;  %v1029_v53 = vld [vmem:[%s1978_s7] ss:$0 sm:$0xff] (%p312_p0) }
 0x18e   : > { %v2066_v3 = vsel %vm1743_vm4, 4294967295, %v2065_v3  ;;  %vm1754_vm2 = vmpackc.low %vm487_vm9, %vm487_vm9 }
 0x18f   : > { %v422_v60 = vpop.permute.xlu1 %421  ;;  %v419_v61 = vpop.permute.xlu0 %418  ;;  %vm1761_vm6 = vmpackc.low %vm483_vm10, %vm483_vm10  ;;  %v551_v39 = vsel %vm1754_vm2, %v1455_v50, 4286578559 }
 0x190   : > { %vm490_vm14 = vcmp.eq.s32.totalorder %v422_v60, 1  ;;  %vm489_vm0 = vcmp.eq.s32.totalorder %v419_v61, 1 }
 0x191   : > { %vm1765_vm4 = vmpackc.low %vm490_vm14, %vm490_vm14  ;;  %vm2081_vm14 = vnez %v2058_v8 }
 0x192   : > { %v2075_v7 = vsel %vm1765_vm4, 4294967295, %v2074_v7  ;;  %vm1772_vm8 = vmpackc.low %vm489_vm0, %vm489_vm0  ;;  %v546_v45 = vsel %vm2081_vm14, %v1541_v62, 4286578559 }
 0x193   : > { %v428_v4 = vpop.permute.xlu1 %427  ;;  %v425_v5 = vpop.permute.xlu0 %424  ;;  %v1011_v8 = vcombine.low %v545_v2, %v546_v45  ;;  %v550_v2 = vsel %vm1735_vm12, %v1486_v59, 4286578559  ;;  %vm2103_vm2 = vnez %v2075_v7 }
 0x194   : > { %vm492_vm3 = vcmp.eq.s32.totalorder %v428_v4, 1  ;;  %vm491_vm15 = vcmp.eq.s32.totalorder %v425_v5, 1  ;;  %v2077_v4 = vmov 0  ;;  %v1009_v5 = vcombine.low %v541_v48, %v542_v46 }
 0x195   : > { %v2078_v4 = vsel %vm1772_vm8, 4294967295, %v2077_v4  ;;  %vm1779_vm9 = vmpackc.low %vm492_vm3, %vm492_vm3  ;;  %v554_v63 = vsel %vm2103_vm2, %v1432_v43, 4286578559  ;;  %v737_v43 = vld [vmem:[#allocation2] sm:$0xff] (%p312_p0) }
 0x196   : > { %v2080_v11 = vsel %vm1779_vm9, 4294967295, %v2079_v11  ;;  %vm1789_vm0 = vmpackc.low %vm491_vm15, %vm491_vm15 }
 0x197   : > { %v434_v54 = vpop.permute.xlu1 %433  ;;  %v431_v6 = vpop.permute.xlu0 %430  ;;  %v555_v60 = vsel %vm1789_vm0, %v1405_v37, 4286578559 }
 0x198   : > { %vm494_vm1 = vcmp.eq.s32.totalorder %v434_v54, 1  ;;  %vm493_vm10 = vcmp.eq.s32.totalorder %v431_v6, 1 }
 0x199   : > { %vm1793_vm8 = vmpackc.low %vm494_vm1, %vm494_vm1 }
 0x19a   : > { %v2086_v9 = vsel %vm1793_vm8, 4294967295, %v2085_v9  ;;  %vm1797_vm9 = vmpackc.low %vm493_vm10, %vm493_vm10 }
 0x19b   : > { %v440_v56 = vpop.permute.xlu1 %439  ;;  %v437_v0 = vpop.permute.xlu0 %436  ;;  %vm2092_vm1 = vmmov %vm2091_vm11 }
 0x19c   : > { %vm496_vm13 = vcmp.eq.s32.totalorder %v440_v56, 1  ;;  %vm495_vm3 = vcmp.eq.s32.totalorder %v437_v0, 1  ;;  %v1806_v56 = vsel %vm2091_vm11, %v1010_v10, 4286644096  ;;  %v1809_v46 = vsel %vm2092_vm1, %v1009_v5, 4286644096 }
 0x19d   : > { %vm1801_vm4 = vmpackc.low %vm496_vm13, %vm496_vm13 }
 0x19e   : > { %vm1811_vm8 = vmpackc.low %vm495_vm3, %vm495_vm3  ;;  %vm2097_vm3 = vnez %v2066_v3  ;;  %v547_v3 = vsel %vm1761_vm6, %v1510_v44, 4286578559  ;;  %v560_v15 = vsel %vm1801_vm4, %v2110_v14, 4286578559  ;;  %v557_v14 = vsel %vm1797_vm9, %v2116_v17, 4286578559 }
 0x19f   : > { %v446_v61 = vpop.permute.xlu1 %445  ;;  %v443_v1 = vpop.permute.xlu0 %442  ;;  %v552_v5 = vsel %vm2097_vm3, %v1460_v51, 4286578559  ;;  %vm2127_vm9 = vcmask 523264  }
 0x1a0   : > { %vm498_vm14 = vcmp.eq.s32.totalorder %v446_v61, 1  ;;  %vm497_vm15 = vcmp.eq.s32.totalorder %v443_v1, 1  ;;  %v549_v61 = vsel %vm1739_vm5, %v1481_v58, 4286578559  ;;  %v1014_v12 = vcombine.low %v551_v39, %v552_v5  ;;  %v2114_v39 = vld [vmem:[#allocation40_spill] sm:$0xff]  ;;  %vm2131_vm2 = vmmov %vm2127_vm9 }
 0x1a1   : > { %vm1821_vm13 = vmpackc.low %vm498_vm14, %vm498_vm14 }
 0x1a2   : > { %vm1831_vm12 = vmpackc.low %vm497_vm15, %vm497_vm15  ;;  %vm2104_vm15 = vnez %v2078_v4 }
 0x1a3   : > { %v452_v6 = vpop.permute.xlu1 %451  ;;  %v449_v49 = vpop.permute.xlu0 %448  ;;  %vm2100_vm14 = vmmov %vm2092_vm1 }
 0x1a4   : > { %vm500_vm10 = vcmp.eq.s32.totalorder %v452_v6, 1  ;;  %vm499_vm11 = vcmp.eq.s32.totalorder %v449_v49, 1  ;;  %v1836_v36 = vsel %vm2100_vm14, %v1011_v8, 4286644096  ;;  %v548_v6 = vsel %vm1750_vm7, %v1515_v47, 4286578559 }
 0x1a5   : > { %vm1841_vm1 = vmpackc.low %vm500_vm10, %vm500_vm10  ;;  %v553_v8 = vsel %vm2104_vm15, %v1427_v42, 4286578559  ;;  %vm2107_vm7 = vnez %v2080_v11  ;;  %v1012_v54 = vcombine.low %v547_v3, %v548_v6  ;;  %v2121_v3 = vld [vmem:[#allocation32_spill] sm:$0xff] }
 0x1a6   : > { %vm1854_vm14 = vmpackc.low %vm499_vm11, %vm499_vm11  ;;  %v1015_v5 = vcombine.low %v553_v8, %v554_v63  ;;  %v2124_v63 = vld [vmem:[#allocation31_spill] sm:$0xff] }
 0x1a7   : > { %v458_v10 = vpop.permute.xlu1 %457  ;;  %v455_v48 = vpop.permute.xlu0 %454  ;;  %v563_v8 = vsel %vm1854_vm14, %v2124_v63, 4286578559  ;;  %vm2133_vm14 = vmmov %vm2131_vm2 }
 0x1a8   : > { %vm502_vm5 = vcmp.eq.s32.totalorder %v458_v10, 1  ;;  %vm501_vm3 = vcmp.eq.s32.totalorder %v455_v48, 1  ;;  %v1013_v10 = vcombine.low %v549_v61, %v550_v2  ;;  %v556_v48 = vsel %vm2107_vm7, %v1410_v38, 4286578559  ;;  %v2111_v2 = vld [vmem:[#allocation35_spill] sm:$0xff]  ;;  %vm2134_vm7 = vmmov %vm2131_vm2 }
 0x1a9   : > { %vm1864_vm6 = vmpackc.low %vm502_vm5, %vm502_vm5  ;;  %v559_v61 = vsel %vm1811_vm8, %v2111_v2, 4286578559  ;;  %vm2115_vm5 = vnez %v2086_v9  ;;  %v1016_v0 = vcombine.low %v555_v60, %v556_v48  ;;  %v2119_v2 = vld [vmem:[#allocation34_spill] sm:$0xff]  ;;  %v564_v9 = vsel %vm1841_vm1, %v2121_v3, 4286578559  ;;  %v2125_v48 = vld [vmem:[#allocation28_spill] sm:$0xff] }
 0x1aa   : > { %vm1874_vm10 = vmpackc.low %vm501_vm3, %vm501_vm3  ;;  %v558_v16 = vsel %vm2115_vm5, %v2114_v39, 4286578559  ;;  %v1018_v17 = vcombine.low %v559_v61, %v560_v15  ;;  %v2126_v60 = vld [vmem:[#allocation27_spill] sm:$0xff]  ;;  %v566_v3 = vsel %vm1864_vm6, %v2129_v40, 4286578559 }
 0x1ab   : > { %v464_v4 = vpop.permute.xlu1 %463  ;;  %v461_v13 = vpop.permute.xlu0 %460  ;;  %v1017_v15 = vcombine.low %v557_v14, %v558_v16  ;;  %v565_v63 = vsel %vm1874_vm10, %v2130_v55, 4286578559  ;;  %v675_v41 = vsel %vm2131_vm2, %v1015_v5, 4286644096  ;;  %v2135_v14 = vld [vmem:[#allocation25_spill] sm:$0xff]  ;;  %v2142_v55 = vld [vmem:[#allocation8_spill] sm:$0xff] }
 0x1ac   : > { %vm504_vm11 = vcmp.eq.s32.totalorder %v464_v4, 1  ;;  %vm503_vm0 = vcmp.eq.s32.totalorder %v461_v13, 1  ;;  %v562_v4 = vsel %vm1821_vm13, %v2119_v2, 4286578559  ;;  %v2120_v13 = vld [vmem:[#allocation33_spill] sm:$0xff]  ;;  %vm2128_vm13 = vmmov %vm2127_vm9 }
 0x1ad   : > { %vm1884_vm4 = vmpackc.low %vm504_vm11, %vm504_vm11  ;;  %v561_v6 = vsel %vm1831_vm12, %v2120_v13, 4286578559  ;;  %v667_v2 = vsel %vm2127_vm9, %v1013_v10, 4286644096  ;;  %v671_v13 = vsel %vm2128_vm13, %v1014_v12, 4286644096 }
 0x1ae   : > { %vm1897_vm8 = vmpackc.low %vm503_vm0, %vm503_vm0  ;;  %v568_v1 = vsel %vm1884_vm4, %v2125_v48, 4286578559  ;;  %v1019_v61 = vcombine.low %v561_v6, %v562_v4  ;;  %v1020_v48 = vcombine.low %v563_v8, %v564_v9  ;;  %v2132_v10 = vld [vmem:[#allocation26_spill] sm:$0xff]  ;;  %v679_v12 = vsel %vm2133_vm14, %v1016_v0, 4286644096 }
 0x1af   : > { %v567_v45 = vsel %vm1897_vm8, %v2126_v60, 4286578559  ;;  %v470_v39 = vpop.permute.xlu1 %469  ;;  %v467_v49 = vpop.permute.xlu0 %466  ;;  %v687_v16 = vsel %vm2134_vm7, %v1018_v17, 4286644096  ;;  %vm2136_vm11 = vmmov %vm2131_vm2  ;;  %v673_v5 = vmax.bf16 %v671_v13, %v1806_v56  ;;  %v669_v0 = vmax.bf16 %v667_v2, %v1809_v46 }
 0x1b0   : > { %vm506_vm12 = vcmp.eq.s32.totalorder %v470_v39, 1  ;;  %vm505_vm1 = vcmp.eq.s32.totalorder %v467_v49, 1  ;;  %v1022_v60 = vcombine.low %v567_v45, %v568_v1  ;;  %v1021_v39 = vcombine.low %v565_v63, %v566_v3  ;;  %vm2137_vm0 = vmmov %vm2131_vm2  ;;  %v2141_v45 = vld [vmem:[#allocation9_spill] sm:$0xff] }
 0x1b1   : > { %vm538_vm3 = vmpackc.low %vm506_vm12, %vm506_vm12  ;;  %v664_v11 = vsel %vm2136_vm11, %v1012_v54, 4286644096  ;;  %v683_v9 = vsel %vm2137_vm0, %v1017_v15, 4286644096  ;;  %v689_v54 = vmax.bf16 %v687_v16, %v673_v5  ;;  %vm731_vm2 = vcmask 516096  }
 0x1b2   : > { %v570_v18 = vsel %vm538_vm3, %v2132_v10, 4286578559  ;;  %vm537_vm15 = vmpackc.low %vm505_vm1, %vm505_vm1  ;;  %v681_v3 = vmax.bf16 %v679_v12, %v664_v11  ;;  %v685_v63 = vmax.bf16 %v683_v9, %v669_v0  ;;  %vm764_vm14 = vcmask (%p312_p0), 23552  }
 0x1b3   : > { %v569_v4 = vsel %vm537_vm15, %v2135_v14, 4286578559  ;;  %v476_v7 = vpop.permute.xlu1 %475  ;;  %v473_v6 = vpop.permute.xlu0 %472  ;;  %vm2138_vm5 = vmmov %vm2137_vm0  ;;  %vm771_vm15 = vcmask (%p312_p0), 1042432  }
 0x1b4   : > { %v1023_v49 = vcombine.low %v569_v4, %v570_v18  ;;  %vm508_vm6 = vcmp.eq.s32.totalorder %v476_v7, 1  ;;  %vm507_vm10 = vcmp.eq.s32.totalorder %v473_v6, 1  ;;  %v691_v8 = vsel %vm2138_vm5, %v1019_v61, 4286644096  ;;  %vm2139_vm8 = vmmov %vm2137_vm0 }
 0x1b5   : > { %vm540_vm4 = vmpackc.low %vm508_vm6, %vm508_vm6  ;;  %v695_v17 = vsel %vm2139_vm8, %v1020_v48, 4286644096  ;;  %v677_v18 = vmax.bf16 %v675_v41, %v1836_v36  ;;  %vm2146_vm5 = vcmask (%p312_p0), 523264   ;;  %vm961_vm8 = vcmask (%p312_p0), 130048  }
 0x1b6   : > { %vm2140_vm9 = vmmov %vm2137_vm0  ;;  %v572_v40 = vsel %vm540_vm4, %v2141_v45, 4286578559  ;;  %v697_v2 = vmax.bf16 %v695_v17, %v681_v3  ;;  %v729_v17 = vld [vmem:[%s728_s0] sm:$0x1]  ;;  %v755_v3 = vld [vmem:[%s1974_s3 + $0x8] sm:$0xff] (%p312_p0)  ;;  %vm958_vm4 = vcmask (%p312_p0), 64512  }
 0x1b7   : > { %v703_v1 = vsel %vm2140_vm9, %v1022_v60, 4286644096  ;;  %vm539_vm13 = vmpackc.low %vm507_vm10, %vm507_vm10  ;;  %v693_v46 = vmax.bf16 %v691_v8, %v677_v18  ;;  %v754_v18 = vld [vmem:[%s1974_s3] sm:$0xff] (%p312_p0) }
 0x1b8   : > { %v571_v56 = vsel %vm539_vm13, %v2142_v55, 4286578559  ;;  %vm2143_vm12 = vmmov %vm2137_vm0  ;;  %v705_v48 = vmax.bf16 %v703_v1, %v689_v54  ;;  %1087 = vmatprep.mubr.msk.f32.mxu0 (%p312_p0), %vm764_vm14, %v754_v18  ;;  %v736_v54 = vld [vmem:[#allocation4] sm:$0xff] (%p312_p0)  ;;  %v1174_v55 = vmov (%p312_p0), 0  }
 0x1b9   : > { %v699_v13 = vsel %vm2143_vm12, %v1021_v39, 4286644096  ;;  %vm2144_vm1 = vmmov %vm2137_vm0  ;;  %v1024_v61 = vcombine.low %v571_v56, %v572_v40  ;;  %v756_v40 = vld [vmem:[%s1975_s4] sm:$0x7] (%p312_p0)  ;;  %1136 = vset.pattern.permute.xlu0 (%p312_p0), %v1174_v55  ;;  %vm746_vm7 = vcmp.gt.f32.partialorder (%p312_p0), %v736_v54, 0.0  ;;  %v738_v20 = vmax.f32 (%p312_p0), %v736_v54, 1.0 }
 0x1ba   : > { %v707_v15 = vsel %vm2144_vm1, %v1023_v49, 4286644096  ;;  %vm2145_vm3 = vmmov %vm2137_vm0  ;;  %v701_v10 = vmax.bf16 %v699_v13, %v685_v63  ;;  %1085 = vmatprep.subr.msk.mxu0 (%p312_p0), %vm771_vm15, %v756_v40  ;;  %v748_v19 = vsel (%p312_p0), %vm746_vm7, 1, %v1174_v55  ;;  %vm867_vm0 = vcmask (%p312_p0), 261120  }
 0x1bb   : > { %v711_v60 = vsel %vm2145_vm3, %v1024_v61, 4286644096  ;;  %v709_v14 = vmax.bf16 %v707_v15, %v693_v46  ;;  %1086 = vmatpush3.msk.msra.mxu0 (%p312_p0), %vm771_vm15, %v756_v40  ;;  %750 = vperm.xlu0 (%p312_p0), %1136, %v748_v19  }
 0x1bc   : > { %v713_v4 = vmax.bf16 %v711_v60, %v697_v2  ;;  %v714_v36 = vmax.bf16 %v705_v48, %v701_v10  ;;  %1088 = vmatmul.mubr.msk.f32.vlgmr.msra.gmra.mxu0 (%p312_p0), %vm764_vm14, %v755_v3 }
 0x1be   : > { %v715_v41 = vmax.bf16 %v713_v4, %v709_v14 }
 0x1bf   :  { %741 = vperm.xlu0 (%p312_p0), %1136, %v738_v20  }
 0x1c0   : > { %v716_v12 = vmax.bf16 %v715_v41, %v714_v36 }
 0x1c2   : > { %v717_v16 = vunpack.i.l.bf16 %v716_v12  ;;  %v718_v7 = vunpack.i.h.bf16 %v716_v12 }
 0x1c4   : > { %v719_v6 = vmax.f32 %v717_v16, %v718_v7 }
 0x1c6   : > { %v720_v39 = vrot.slane %v719_v6, 4 }
 0x1c8   : > { %v721_v11 = vmax.f32 %v719_v6, %v720_v39 }
 0x1ca   : > { %v722_v49 = vrot.slane %v721_v11, 2 }
 0x1cc   : > { %v723_v5 = vmax.f32 %v721_v11, %v722_v49 }
 0x1ce   : > { %v724_v9 = vrot.slane %v723_v5, 1 }
 0x1d0   : > { %v725_v8 = vmax.f32 %v723_v5, %v724_v9 }
 0x1d2   : > { %v726_v0 = vpack.i.bf16 %v725_v8, %v725_v8 }
 0x1d4   : > { %v727_v1 = vunpack.c.l.bf16 %v726_v0  ;;  %314 = sbr.rel (!%p312_p0) target bundleno = 249 (0xf9), region = 68 }
 0x1d6   : > { %v730_v45 = vmax.f32 %v729_v17, %v727_v1 }
 0x1d8   : > { %732 = vst.msk [vmem:[%s728_s0] sm:$0x1] %vm731_vm2, %v730_v45 }
 0x1df   :  { %v747_v25 = vld [vmem:[#allocation3] sm:$0xff] }
 0x236   :  { %v751_v26 = vpop.permute.xlu0 %750 }
 0x237   :  { %vm752_vm6 = vcmp.eq.s32.totalorder %v751_v26, 1 }
 0x238   :  { %v753_v27 = vsel %vm752_vm6, %v747_v25, 0.0 }
 0x239   :  { %950 = vrot.lane.b32.xlu1 %v753_v27, %s1175_s11 }
 0x23a   :  { %v742_v38 = vpop.permute.xlu0 %741 }
 0x23b   :  { %1137 = vrcp.f32 %v742_v38 }
 0x248   :  { %v1138_v42 = vpop.eup %1137 }
 0x249   :  { %v745_v51 = vmul.f32 %v1138_v42, %v737_v43 }
 0x27c   :  { %v1089_v29 = vpop.f32.mrf.mxu0 }
 0x27d   :  { %v847_v30 = vadd.f32 %v1089_v29, %v1025_v28 }
 0x27e   :  { %v841_v31 = vpop.f32.mrf.mxu0 }
 0x27f   :  { %v842_v32 = vadd.f32 %v1025_v28, %v841_v31  ;;  %v853_v33 = vmul.f32 0.01, %v847_v30  ;;  %vm851_vm10 = vcmp.gt.f32.partialorder %v847_v30, 0.0 }
 0x281   :  { %vm850_vm11 = vcmp.gt.f32.partialorder %v842_v32, 0.0  ;;  %v852_v34 = vmul.f32 0.01, %v842_v32  ;;  %v855_v37 = vsel %vm851_vm10, %v847_v30, %v853_v33 }
 0x283   :  { %v854_v35 = vsel %vm850_vm11, %v842_v32, %v852_v34 }
 0x284   :  { %1098 = vmatprep.mubr.msk.f32.mxu1 %vm867_vm0, %v854_v35 }
 0x285   :  { %1099 = vmatmul.mubr.msk.f32.vlgmr.msra.gmra.mxu1 %vm867_vm0, %v855_v37 }
 0x2ab   :  { %v951_v50 = vpop.permute.xlu1 %950 }
 0x2ac   :  { %v957_v52 = vsel %vm2146_vm5, %v745_v51, %v951_v50 }
 0x2ad   :  { %960 = vst [vmem:[#allocation5] sm:$0xff] %v957_v52 }
 0x345   :  { %v1100_v58 = vpop.f32.mrf.mxu1 }
 0x346   :  { %v946_v59 = vadd.f32 %v1100_v58, %v1029_v53 }
 0x347   :  { %v940_v44 = vpop.f32.mrf.mxu1 }
 0x348   :  { %954 = vrot.lane.b32.xlu1 %v946_v59, %s1176_s13  ;;  %v941_v47 = vadd.f32 %v1029_v53, %v940_v44 }
 0x3ba   :  { %v955_v57 = vpop.permute.xlu1 %954 }
 0x3bb   :  { %v959_v62 = vsel %vm958_vm4, %v941_v47, %v955_v57 }
 0x3bc   :  { %962 = vst.msk [vmem:[#allocation5 + $0x8] sm:$0xff] %vm961_vm8, %v959_v62 }
 0x3bd   :  { %1150 = shalt.err (!%p1147_p5)
}
 0x3be   :  { %972 = dma.vmem_to_hbm [thread:$0]  %s970_s15, 256, %s1979_s8, [#allocation6]  }
 0x3bf   :  { %1163 = dma.done.wait [#allocation6], 256  }
 0x3c0   :  { %1164 = vsyncadd [#allocation6], 4294967040 }
 0x3c1   :  { %976 = vsyncpa [#allocation6], 1 }

</bundles_post_ra>
